<compile_context>
chip_gen: v7x
topology: tpu7x:2x2x1
jax: 0.10.0
libtpu: 0.0.40
codegen_flags: <defaults>
</compile_context>

<pallas_src>
import functools

import jax
import jax.numpy as jnp
from jax import lax
from jax.experimental import pallas as pl
from jax.experimental.pallas import tpu as pltpu

EPS = 1e-5  # nn.BatchNorm2d default eps


# ------------------------------ Pallas kernels --------------------------------
def _stats_kernel(p_ref, w_ref, sum_ref, sumsq_ref):
    """Accumulate per-channel sum / sum-of-squares of conv = W @ P over M tiles.

    p_ref:   (K, tile_m)    im2col patches tile, channel-major (compute dtype)
    w_ref:   (4*Cout, K)    fused branch weights (compute dtype)
    sum_ref, sumsq_ref: (4*Cout, 1) f32 resident accumulators.
    """
    @pl.when(pl.program_id(0) == 0)
    def _():
        sum_ref[...] = jnp.zeros_like(sum_ref)
        sumsq_ref[...] = jnp.zeros_like(sumsq_ref)

    conv = jnp.dot(w_ref[...], p_ref[...],
                   preferred_element_type=jnp.float32)        # (4C, tile_m) f32
    sum_ref[...] += jnp.sum(conv, axis=1, keepdims=True)
    sumsq_ref[...] += jnp.sum(conv * conv, axis=1, keepdims=True)


def _decoder_kernel(p_ref, w_ref, scale_ref, shift_ref, wr_ref, br_ref, out_ref):
    """Fused conv (+folded BatchNorm) + ELU + 1x1 reduce for one M tile.

    p_ref:  (K, tile_m)        im2col patches tile
    w_ref:  (4*Cout, K)        fused branch weights
    scale_ref, shift_ref: (4*Cout, 1) f32  folded BN affine
    wr_ref: (Cout, 4*Cout) f32 1x1 reduce weights
    br_ref: (Cout, 1) f32      reduce bias
    out_ref: (Cout, tile_m) f32 (lane-dense store)
    """
    conv = jnp.dot(w_ref[...], p_ref[...],
                   preferred_element_type=jnp.float32)        # (4C, tile_m)
    y = conv * scale_ref[...] + shift_ref[...]                # BatchNorm (folded)
    # ELU(alpha=1); clamp the exp argument so the discarded branch never infs.
    y = jnp.where(y > 0, y, jnp.exp(jnp.minimum(y, 0.0)) - 1.0)
    red = jnp.dot(wr_ref[...], y, preferred_element_type=jnp.float32)
    out_ref[...] = (red + br_ref[...]).astype(out_ref.dtype)


# --------------------------------- forward ------------------------------------
def decoder_part_forward(x_nchw, params, *, stride=2, padding=1, kernel=3,
                         output_padding=1, tile_m=1024,
                         compute_dtype=jnp.float32):
    N, Cin, H, W = x_nchw.shape
    k = kernel
    Ho = (H - 1) * stride - 2 * padding + k + output_padding
    Wo = (W - 1) * stride - 2 * padding + k + output_padding
    K = Cin * k * k
    Cout = params["wt"][0].shape[1]
    C4 = 4 * Cout
    M = N * Ho * Wo

    # ---- layout glue (plain JAX, fused under jit) -----------------------------
    # ConvTranspose2d == stride-1 cross-correlation of the zero-dilated,
    # (k-1-p)-padded input with the spatially flipped, channel-swapped weights.
    pad_lo = k - 1 - padding
    pad_hi = k - 1 - padding + output_padding
    assert pad_lo >= 0, "kernel/padding combination not supported"

    x_cf = jnp.transpose(x_nchw, (1, 0, 2, 3)).astype(compute_dtype)  # (Cin,N,H,W)
    Hd = (H - 1) * stride + 1
    Wd = (W - 1) * stride + 1
    x_dil = jnp.zeros((Cin, N, Hd, Wd), compute_dtype)
    x_dil = x_dil.at[:, :, ::stride, ::stride].set(x_cf)
    x_pad = jnp.pad(x_dil, ((0, 0), (0, 0), (pad_lo, pad_hi), (pad_lo, pad_hi)))

    # TODO(synk): build the k*k taps inside the kernel from a haloed x_pad block
    # to remove the k*k (=9x) im2col HBM read amplification.
    taps = [x_pad[:, :, ki:ki + Ho, kj:kj + Wo]
            for ki in range(k) for kj in range(k)]               # (Cin,N,Ho,Wo)
    patches_t = jnp.stack(taps, axis=1).reshape(K, M)            # (K, M)

    # Fused branch weights: rows ordered [branch, cout], cols [cin, ki, kj].
    w_rows = []
    for wt in params["wt"]:
        w_flip = wt[:, :, ::-1, ::-1]                            # (Cin,Cout,k,k)
        w_rows.append(jnp.transpose(w_flip, (1, 0, 2, 3)).reshape(Cout, K))
    w_cat_t = jnp.concatenate(w_rows, axis=0).astype(compute_dtype)  # (4C, K)

    gamma_col = jnp.concatenate(params["gamma"]).reshape(C4, 1).astype(jnp.float32)
    beta_col = jnp.concatenate(params["beta"]).reshape(C4, 1).astype(jnp.float32)
    wr_t = params["w_reduce"][:, :, 0, 0].astype(jnp.float32)         # (Cout, 4C)
    br_col = params["b_reduce"].reshape(Cout, 1).astype(jnp.float32)
    # Note: the ConvTranspose2d biases are NOT needed — training-mode BatchNorm
    # subtracts the batch mean, which cancels a per-channel constant exactly.

    # ---- M tiling -------------------------------------------------------------
    tile_m = max(128, (int(tile_m) // 128) * 128)
    tile_m = min(tile_m, ((M + 127) // 128) * 128)
    m_pad = ((M + tile_m - 1) // tile_m) * tile_m
    num_tiles = m_pad // tile_m
    if m_pad != M:
        patches_t = jnp.pad(patches_t, ((0, 0), (0, m_pad - M)))

    itemsize = jnp.dtype(compute_dtype).itemsize
    patch_bytes = K * m_pad * itemsize

    # ---- pass 1: BatchNorm batch statistics (training mode) -------------------
    conv_sum, conv_sumsq = pl.pallas_call(
        _stats_kernel,
        grid=(num_tiles,),
        in_specs=[
            pl.BlockSpec((K, tile_m), lambda i: (0, i)),
            pl.BlockSpec((C4, K), lambda i: (0, 0)),
        ],
        out_specs=[
            pl.BlockSpec((C4, 1), lambda i: (0, 0)),
            pl.BlockSpec((C4, 1), lambda i: (0, 0)),
        ],
        out_shape=[
            jax.ShapeDtypeStruct((C4, 1), jnp.float32),
            jax.ShapeDtypeStruct((C4, 1), jnp.float32),
        ],
        compiler_params=pltpu.CompilerParams(
            dimension_semantics=("arbitrary",),            # resident accumulators
            vmem_limit_bytes=64 * 1024 * 1024),
        cost_estimate=pl.CostEstimate(
            flops=2 * m_pad * K * C4 + 4 * m_pad * C4,
            transcendentals=0,
            bytes_accessed=patch_bytes + C4 * K * itemsize + 2 * C4 * 4),
    )(patches_t, w_cat_t)

    # Zero-padded columns contribute 0 to both sums; normalize by the true M.
    mean_nb = conv_sum / float(M)                    # mean of conv WITHOUT bias
    var = conv_sumsq / float(M) - mean_nb * mean_nb  # biased batch variance
    inv = lax.rsqrt(jnp.maximum(var, 0.0) + EPS)
    scale = gamma_col * inv                          # fold BN into one affine
    shift = beta_col - mean_nb * scale

    # ---- pass 2: conv + BN + ELU + 1x1 reduce (parallel over M tiles) ---------
    out_t = pl.pallas_call(
        _decoder_kernel,
        grid=(num_tiles,),
        in_specs=[
            pl.BlockSpec((K, tile_m), lambda i: (0, i)),
            pl.BlockSpec((C4, K), lambda i: (0, 0)),
            pl.BlockSpec((C4, 1), lambda i: (0, 0)),
            pl.BlockSpec((C4, 1), lambda i: (0, 0)),
            pl.BlockSpec((Cout, C4), lambda i: (0, 0)),
            pl.BlockSpec((Cout, 1), lambda i: (0, 0)),
        ],
        out_specs=pl.BlockSpec((Cout, tile_m), lambda i: (0, i)),
        out_shape=jax.ShapeDtypeStruct((Cout, m_pad), jnp.float32),
        compiler_params=pltpu.CompilerParams(
            dimension_semantics=("parallel",),             # megacore-shardable
            vmem_limit_bytes=64 * 1024 * 1024),
        cost_estimate=pl.CostEstimate(
            flops=2 * m_pad * K * C4 + 2 * m_pad * C4 * Cout + 3 * m_pad * C4,
            transcendentals=m_pad * C4,
            bytes_accessed=patch_bytes + Cout * m_pad * 4 + C4 * K * itemsize),
    )(patches_t, w_cat_t, scale, shift, wr_t, br_col)

    out = out_t[:, :M].reshape(Cout, N, Ho, Wo)
    return jnp.transpose(out, (1, 0, 2, 3))                      # NCHW


# ----------------------------- pure-JAX reference ------------------------------
def decoder_part_reference(x_nchw, params, *, stride=2, padding=1, kernel=3,
                           output_padding=1):
    k = kernel
    pad_lo = k - 1 - padding
    pad_hi = k - 1 - padding + output_padding
    x = jnp.transpose(x_nchw, (0, 2, 3, 1)).astype(jnp.float32)
    outs = []
    for wt, bt, g, b in zip(params["wt"], params["bt"], params["gamma"],
                            params["beta"]):
        rhs = jnp.transpose(wt[:, :, ::-1, ::-1], (2, 3, 0, 1))    # HWIO
        y = lax.conv_general_dilated(
            x, rhs, window_strides=(1, 1),
            padding=((pad_lo, pad_hi), (pad_lo, pad_hi)),
            lhs_dilation=(stride, stride),
            dimension_numbers=("NHWC", "HWIO", "NHWC"),
            precision=lax.Precision.HIGHEST)
        y = y + bt
        mean = y.mean(axis=(0, 1, 2))
        var = ((y - mean) ** 2).mean(axis=(0, 1, 2))
        y = (y - mean) / jnp.sqrt(var + EPS) * g + b
        y = jnp.where(y > 0, y, jnp.exp(y) - 1.0)
        outs.append(y)
    cat = jnp.concatenate(outs, axis=-1)
    wr = jnp.transpose(params["w_reduce"][:, :, 0, 0], (1, 0))
    red = jnp.einsum("nhwc,cd->nhwd", cat, wr,
                     precision=lax.Precision.HIGHEST) + params["b_reduce"]
    return jnp.transpose(red, (0, 3, 1, 2))


def init_params(key, in_channel, out_channel, kernel):
    keys = jax.random.split(key, 16)
    fan = in_channel * kernel * kernel
    bound = 1.0 / jnp.sqrt(fan)
    params = {"wt": [], "bt": [], "gamma": [], "beta": []}
    for i in range(4):
        params["wt"].append(jax.random.uniform(
            keys[i], (in_channel, out_channel, kernel, kernel),
            minval=-bound, maxval=bound, dtype=jnp.float32))
        params["bt"].append(jax.random.uniform(
            keys[4 + i], (out_channel,), minval=-bound, maxval=bound,
            dtype=jnp.float32))
        params["gamma"].append(1.0 + 0.1 * jax.random.normal(
            keys[8 + i], (out_channel,), dtype=jnp.float32))
        params["beta"].append(0.1 * jax.random.normal(
            keys[12 + i], (out_channel,), dtype=jnp.float32))
    kr = jax.random.split(keys[15], 2)
    rb = 1.0 / jnp.sqrt(4 * out_channel)
    params["w_reduce"] = jax.random.uniform(
        kr[0], (out_channel, 4 * out_channel, 1, 1), minval=-rb, maxval=rb,
        dtype=jnp.float32)
    params["b_reduce"] = jax.random.uniform(
        kr[1], (out_channel,), minval=-rb, maxval=rb, dtype=jnp.float32)
    return params


if __name__ == "__main__":
    key = jax.random.PRNGKey(0)
    k_x, k_p = jax.random.split(key)

    N, Cin, Cout, H, W = 2, 8, 8, 16, 16
    out_pad, kern = 1, 3

    x = jax.random.normal(k_x, (N, Cin, H, W), dtype=jnp.float32)   # NCHW
    params = init_params(k_p, Cin, Cout, kern)

    ref = decoder_part_reference(x, params, output_padding=out_pad, kernel=kern)

    # f32 path (strict numerics); tile_m=512 -> 4-tile grid exercises pipelining
    # and the cross-tile BatchNorm accumulation.
    fwd_f32 = jax.jit(functools.partial(
        decoder_part_forward, output_padding=out_pad, kernel=kern,
        tile_m=512, compute_dtype=jnp.float32))
    out = jax.block_until_ready(fwd_f32(x, params))
    assert out.shape == (N, Cout, 2 * H, 2 * W), out.shape
    assert jnp.allclose(out, ref, atol=2e-3, rtol=2e-3), \
        float(jnp.max(jnp.abs(out - ref)))

    # bf16 MXU path (v6e/v7x recommendation) — f32 accumulation, looser check.
    fwd_bf16 = jax.jit(functools.partial(
        decoder_part_forward, output_padding=out_pad, kernel=kern,
        tile_m=512, compute_dtype=jnp.bfloat16))
    out_bf16 = jax.block_until_ready(fwd_bf16(x, params))
    assert out_bf16.shape == (N, Cout, 2 * H, 2 * W), out_bf16.shape
    assert jnp.allclose(out_bf16, ref, atol=6e-2, rtol=6e-2), \
        float(jnp.max(jnp.abs(out_bf16 - ref)))

    print("KERNEL_OK")
</pallas_src>

<mosaic_0001>
module attributes {stable_mosaic.version = 11 : i64} {
  func.func @_stats_kernel(%arg0: i32, %arg1: memref<72x512xf32, #tpu.memory_space<vmem>>, %arg2: memref<32x72xf32, #tpu.memory_space<vmem>>, %arg3: memref<32x1xf32, #tpu.memory_space<vmem>>, %arg4: memref<32x1xf32, #tpu.memory_space<vmem>>) attributes {dimension_semantics = [#tpu.dimension_semantics<arbitrary>], iteration_bounds = array<i64: 4>, scalar_prefetch = 0 : i64, scratch_operands = 0 : i64, tpu.core_type = #tpu.core_type<tc>, window_params = [{transform_indices = @transform_0, window_bounds = array<i64: 72, 512>}, {pipeline_mode = #tpu.pipeline_mode<synchronous>, transform_indices = @transform_1, window_bounds = array<i64: 32, 72>}, {pipeline_mode = #tpu.pipeline_mode<synchronous>, transform_indices = @transform_2, window_bounds = array<i64: 32, 1>}, {pipeline_mode = #tpu.pipeline_mode<synchronous>, transform_indices = @transform_3, window_bounds = array<i64: 32, 1>}]} {
    %c0_i32 = arith.constant 0 : i32
    %0 = arith.cmpi eq, %arg0, %c0_i32 : i32
    %1 = arith.extui %0 : i1 to i32
    %c0_i32_0 = arith.constant 0 : i32
    %2 = arith.cmpi ne, %1, %c0_i32_0 : i32
    scf.if %2 {
      %cst_14 = arith.constant 0.000000e+00 : f32
      %17 = vector.broadcast %cst_14 : f32 to vector<32x1xf32>
      %c0_15 = arith.constant 0 : index
      %c0_16 = arith.constant 0 : index
      %18 = vector.load %arg3[%c0_15, %c0_16] : memref<32x1xf32, #tpu.memory_space<vmem>>, vector<32x1xf32>
      tpu.vector_store %arg3[%c0_15, %c0_16], %17 {strides = array<i32>} : memref<32x1xf32, #tpu.memory_space<vmem>>, vector<32x1xf32>,
      %cst_17 = arith.constant 0.000000e+00 : f32
      %19 = vector.broadcast %cst_17 : f32 to vector<32x1xf32>
      %c0_18 = arith.constant 0 : index
      %c0_19 = arith.constant 0 : index
      %20 = vector.load %arg4[%c0_18, %c0_19] : memref<32x1xf32, #tpu.memory_space<vmem>>, vector<32x1xf32>
      tpu.vector_store %arg4[%c0_18, %c0_19], %19 {strides = array<i32>} : memref<32x1xf32, #tpu.memory_space<vmem>>, vector<32x1xf32>,
    } else {
    }
    %c0 = arith.constant 0 : index
    %c0_1 = arith.constant 0 : index
    %3 = vector.load %arg2[%c0, %c0_1] : memref<32x72xf32, #tpu.memory_space<vmem>>, vector<32x72xf32>
    %c0_2 = arith.constant 0 : index
    %c0_3 = arith.constant 0 : index
    %4 = vector.load %arg1[%c0_2, %c0_3] : memref<72x512xf32, #tpu.memory_space<vmem>>, vector<72x512xf32>
    %cst = arith.constant dense<0.000000e+00> : vector<32x512xf32>
    %5 = tpu.matmul %3, %4, %cst {dimension_numbers = #tpu.dot_dimension_numbers<[1], [0], [0], [1], [0, 0, 1, 1], [], []>} : vector<32x72xf32>, vector<72x512xf32>, vector<32x512xf32> -> vector<32x512xf32>
    %c0_4 = arith.constant 0 : index
    %c0_5 = arith.constant 0 : index
    %6 = vector.load %arg3[%c0_4, %c0_5] : memref<32x1xf32, #tpu.memory_space<vmem>>, vector<32x1xf32>
    %cst_6 = arith.constant dense<0.000000e+00> : vector<32xf32>
    %7 = vector.multi_reduction <add>, %5, %cst_6 [1] : vector<32x512xf32> to vector<32xf32>
    %8 = vector.shape_cast %7 : vector<32xf32> to vector<32x1xf32>
    %9 = arith.addf %6, %8 : vector<32x1xf32>
    %c0_7 = arith.constant 0 : index
    %c0_8 = arith.constant 0 : index
    %10 = vector.load %arg3[%c0_7, %c0_8] : memref<32x1xf32, #tpu.memory_space<vmem>>, vector<32x1xf32>
    tpu.vector_store %arg3[%c0_7, %c0_8], %9 {strides = array<i32>} : memref<32x1xf32, #tpu.memory_space<vmem>>, vector<32x1xf32>,
    %c0_9 = arith.constant 0 : index
    %c0_10 = arith.constant 0 : index
    %11 = vector.load %arg4[%c0_9, %c0_10] : memref<32x1xf32, #tpu.memory_space<vmem>>, vector<32x1xf32>
    %12 = arith.mulf %5, %5 : vector<32x512xf32>
    %cst_11 = arith.constant dense<0.000000e+00> : vector<32xf32>
    %13 = vector.multi_reduction <add>, %12, %cst_11 [1] : vector<32x512xf32> to vector<32xf32>
    %14 = vector.shape_cast %13 : vector<32xf32> to vector<32x1xf32>
    %15 = arith.addf %11, %14 : vector<32x1xf32>
    %c0_12 = arith.constant 0 : index
    %c0_13 = arith.constant 0 : index
    %16 = vector.load %arg4[%c0_12, %c0_13] : memref<32x1xf32, #tpu.memory_space<vmem>>, vector<32x1xf32>
    tpu.vector_store %arg4[%c0_12, %c0_13], %15 {strides = array<i32>} : memref<32x1xf32, #tpu.memory_space<vmem>>, vector<32x1xf32>,
    return
  }
  func.func @transform_0(%arg0: i32) -> (i32, i32) {
    %c0_i32 = arith.constant 0 : i32
    %c0_i32_0 = arith.constant 0 : i32
    return %c0_i32, %arg0 : i32, i32
  }
  func.func @transform_1(%arg0: i32) -> (i32, i32) {
    %c0_i32 = arith.constant 0 : i32
    %c0_i32_0 = arith.constant 0 : i32
    %c0_i32_1 = arith.constant 0 : i32
    return %c0_i32, %c0_i32_0 : i32, i32
  }
  func.func @transform_2(%arg0: i32) -> (i32, i32) {
    %c0_i32 = arith.constant 0 : i32
    %c0_i32_0 = arith.constant 0 : i32
    %c0_i32_1 = arith.constant 0 : i32
    return %c0_i32, %c0_i32_0 : i32, i32
  }
  func.func @transform_3(%arg0: i32) -> (i32, i32) {
    %c0_i32 = arith.constant 0 : i32
    %c0_i32_0 = arith.constant 0 : i32
    %c0_i32_1 = arith.constant 0 : i32
    return %c0_i32, %c0_i32_0 : i32, i32
  }
}

module attributes {stable_mosaic.version = 11 : i64} {
  func.func @_decoder_kernel(%arg0: i32, %arg1: memref<72x512xf32, #tpu.memory_space<vmem>>, %arg2: memref<32x72xf32, #tpu.memory_space<vmem>>, %arg3: memref<32x1xf32, #tpu.memory_space<vmem>>, %arg4: memref<32x1xf32, #tpu.memory_space<vmem>>, %arg5: memref<8x32xf32, #tpu.memory_space<vmem>>, %arg6: memref<8x1xf32, #tpu.memory_space<vmem>>, %arg7: memref<8x512xf32, #tpu.memory_space<vmem>>) attributes {dimension_semantics = [#tpu.dimension_semantics<parallel>], iteration_bounds = array<i64: 4>, scalar_prefetch = 0 : i64, scratch_operands = 0 : i64, tpu.core_type = #tpu.core_type<tc>, window_params = [{transform_indices = @transform_0, window_bounds = array<i64: 72, 512>}, {pipeline_mode = #tpu.pipeline_mode<synchronous>, transform_indices = @transform_1, window_bounds = array<i64: 32, 72>}, {pipeline_mode = #tpu.pipeline_mode<synchronous>, transform_indices = @transform_2, window_bounds = array<i64: 32, 1>}, {pipeline_mode = #tpu.pipeline_mode<synchronous>, transform_indices = @transform_3, window_bounds = array<i64: 32, 1>}, {pipeline_mode = #tpu.pipeline_mode<synchronous>, transform_indices = @transform_4, window_bounds = array<i64: 8, 32>}, {pipeline_mode = #tpu.pipeline_mode<synchronous>, transform_indices = @transform_5, window_bounds = array<i64: 8, 1>}, {transform_indices = @transform_6, window_bounds = array<i64: 8, 512>}]} {
    %c0 = arith.constant 0 : index
    %c0_0 = arith.constant 0 : index
    %0 = vector.load %arg2[%c0, %c0_0] : memref<32x72xf32, #tpu.memory_space<vmem>>, vector<32x72xf32>
    %c0_1 = arith.constant 0 : index
    %c0_2 = arith.constant 0 : index
    %1 = vector.load %arg1[%c0_1, %c0_2] : memref<72x512xf32, #tpu.memory_space<vmem>>, vector<72x512xf32>
    %cst = arith.constant dense<0.000000e+00> : vector<32x512xf32>
    %2 = tpu.matmul %0, %1, %cst {dimension_numbers = #tpu.dot_dimension_numbers<[1], [0], [0], [1], [0, 0, 1, 1], [], []>} : vector<32x72xf32>, vector<72x512xf32>, vector<32x512xf32> -> vector<32x512xf32>
    %c0_3 = arith.constant 0 : index
    %c0_4 = arith.constant 0 : index
    %3 = vector.load %arg3[%c0_3, %c0_4] : memref<32x1xf32, #tpu.memory_space<vmem>>, vector<32x1xf32>
    %4 = vector.broadcast %3 : vector<32x1xf32> to vector<32x512xf32>
    %5 = arith.mulf %2, %4 : vector<32x512xf32>
    %c0_5 = arith.constant 0 : index
    %c0_6 = arith.constant 0 : index
    %6 = vector.load %arg4[%c0_5, %c0_6] : memref<32x1xf32, #tpu.memory_space<vmem>>, vector<32x1xf32>
    %7 = vector.broadcast %6 : vector<32x1xf32> to vector<32x512xf32>
    %8 = arith.addf %5, %7 : vector<32x512xf32>
    %cst_7 = arith.constant 0.000000e+00 : f32
    %9 = vector.broadcast %cst_7 : f32 to vector<32x512xf32>
    %10 = arith.cmpf ogt, %8, %9 : vector<32x512xf32>
    %cst_8 = arith.constant 0.000000e+00 : f32
    %11 = vector.broadcast %cst_8 : f32 to vector<32x512xf32>
    %12 = arith.minimumf %8, %11 : vector<32x512xf32>
    %13 = math.exp %12 : vector<32x512xf32>
    %cst_9 = arith.constant 1.000000e+00 : f32
    %14 = vector.broadcast %cst_9 : f32 to vector<32x512xf32>
    %15 = arith.subf %13, %14 : vector<32x512xf32>
    %16 = arith.select %10, %8, %15 : vector<32x512xi1>, vector<32x512xf32>
    %c0_10 = arith.constant 0 : index
    %c0_11 = arith.constant 0 : index
    %17 = vector.load %arg5[%c0_10, %c0_11] : memref<8x32xf32, #tpu.memory_space<vmem>>, vector<8x32xf32>
    %cst_12 = arith.constant dense<0.000000e+00> : vector<8x512xf32>
    %18 = tpu.matmul %17, %16, %cst_12 {dimension_numbers = #tpu.dot_dimension_numbers<[1], [0], [0], [1], [0, 0, 1, 1], [], []>} : vector<8x32xf32>, vector<32x512xf32>, vector<8x512xf32> -> vector<8x512xf32>
    %c0_13 = arith.constant 0 : index
    %c0_14 = arith.constant 0 : index
    %19 = vector.load %arg6[%c0_13, %c0_14] : memref<8x1xf32, #tpu.memory_space<vmem>>, vector<8x1xf32>
    %20 = vector.broadcast %19 : vector<8x1xf32> to vector<8x512xf32>
    %21 = arith.addf %18, %20 : vector<8x512xf32>
    %c0_15 = arith.constant 0 : index
    %c0_16 = arith.constant 0 : index
    %22 = vector.load %arg7[%c0_15, %c0_16] : memref<8x512xf32, #tpu.memory_space<vmem>>, vector<8x512xf32>
    tpu.vector_store %arg7[%c0_15, %c0_16], %21 {strides = array<i32>} : memref<8x512xf32, #tpu.memory_space<vmem>>, vector<8x512xf32>,
    return
  }
  func.func @transform_0(%arg0: i32) -> (i32, i32) {
    %c0_i32 = arith.constant 0 : i32
    %c0_i32_0 = arith.constant 0 : i32
    return %c0_i32, %arg0 : i32, i32
  }
  func.func @transform_1(%arg0: i32) -> (i32, i32) {
    %c0_i32 = arith.constant 0 : i32
    %c0_i32_0 = arith.constant 0 : i32
    %c0_i32_1 = arith.constant 0 : i32
    return %c0_i32, %c0_i32_0 : i32, i32
  }
  func.func @transform_2(%arg0: i32) -> (i32, i32) {
    %c0_i32 = arith.constant 0 : i32
    %c0_i32_0 = arith.constant 0 : i32
    %c0_i32_1 = arith.constant 0 : i32
    return %c0_i32, %c0_i32_0 : i32, i32
  }
  func.func @transform_3(%arg0: i32) -> (i32, i32) {
    %c0_i32 = arith.constant 0 : i32
    %c0_i32_0 = arith.constant 0 : i32
    %c0_i32_1 = arith.constant 0 : i32
    return %c0_i32, %c0_i32_0 : i32, i32
  }
  func.func @transform_4(%arg0: i32) -> (i32, i32) {
    %c0_i32 = arith.constant 0 : i32
    %c0_i32_0 = arith.constant 0 : i32
    %c0_i32_1 = arith.constant 0 : i32
    return %c0_i32, %c0_i32_0 : i32, i32
  }
  func.func @transform_5(%arg0: i32) -> (i32, i32) {
    %c0_i32 = arith.constant 0 : i32
    %c0_i32_0 = arith.constant 0 : i32
    %c0_i32_1 = arith.constant 0 : i32
    return %c0_i32, %c0_i32_0 : i32, i32
  }
  func.func @transform_6(%arg0: i32) -> (i32, i32) {
    %c0_i32 = arith.constant 0 : i32
    %c0_i32_0 = arith.constant 0 : i32
    return %c0_i32, %arg0 : i32, i32
  }
}

</mosaic_0001>

<bundles_post_ra>
// kernel: decoder_part_forward.2
= control target key start
LH: loop header
LB: loop body
LE: loop exit
PB: predicated region body
PF: predicated region fallthrough
CT: control target
= control target key end

     0   :  { %9 = vsyncpa [#allocation3], 0  ;;  %s1192_s0 = inlined_call_operand.hbm [shape: f32[72,2048], index: 0, kind: input, shape index: {}]   ;;  %s1193_s1 = inlined_call_operand.hbm [shape: f32[32,72], index: 1, kind: input, shape index: {}]   ;;  %s1194_s2 = inlined_call_operand.hbm [shape: f32[32,1], index: 2, kind: output, shape index: {0}]   ;;  %s1195_s3 = inlined_call_operand.hbm [shape: f32[32,1], index: 3, kind: output, shape index: {1}]  }
   0x1   :  { %11 = vsyncpa [#allocation3 + $0x1], 0 }
   0x2   :  { %12 = vsyncpa [#allocation6], 0 }
   0x3   :  { %13 = vsyncpa [#allocation4], 0 }
   0x4   :  { %14 = vsyncpa [#allocation9], 0  ;;  %s932_s12 = smov 0   ;;  %s934_s13 = smov 0  }
   0x5   :  { %s936_s14 = smov 0   ;;  %s938_s15 = smov 0  }
   0x6 LB: > { %s951_s16 = sadd.s32 4294967295, %s897_s15   ;;  %s954_s17 = sadd.s32 1, %s897_s15   ;;  %s897_s15 = sphi %s938_s15, %s1214_s15   ;;  %s893_s14 = sphi %s936_s14, %s1213_s14   ;;  %s889_s13 = sphi %s934_s13, %s1212_s13   ;;  %s885_s12 = sphi %s932_s12, %s1211_s12  }
   0x7   : > { %s24_s18 = ssub.s32 %s897_s15, %s954_s17  ;;  %s27_s19 = sadd.s32 1, %s893_s14 }
   0x8   : > { %p25_p0 = scmp.eq.s32.totalorder %s24_s18, 0  ;;  %p34_p1 = scmp.ne.s32.totalorder %s893_s14, %s889_s13 }
   0x9   : > { %p35_p2 = scmp.eq.s32.totalorder %s897_s15, 0  ;;  %p40_p3 = scmp.ne.s32.totalorder %s889_s13, %s885_s12 }
   0xa   : > { %s964_s20 = scalar_select %p25_p0, %s893_s14, %s27_s19  }
   0xb   : > { %p966_p4 = por %p35_p2, %p34_p1  ;;  %p1196_p5 = scmp.eq.s32.totalorder %s951_s16, 0 }
   0xc   : > { %p611_p6 = scmp.ge.s32.totalorder %s897_s15, 1  ;;  %p114_p7 = scmp.lt.s32.totalorder %s897_s15, 5 }
   0xd   : > { %p975_p8 = por %p1196_p5, %p40_p3  ;;  %s899_s24 = smov [#allocation5]  }
   0xe   : > { %p980_p10 = pnand %p611_p6, %p114_p7  ;;  %s126_s25 = sshll.u32 %s899_s24, 4  ;;  %s127_s25 = int_to_ptr.vmem [resolvable:$true] %s126_s25 }
   0xf   : > { %s1201_s22 = scalar_select %p975_p8, 1, 0 }
  0x10   : > { %s1202_s23 = scalar_select %p980_p10, 1, 0 }
  0x11   : > { %p682_p11 = pneg %p980_p10  ;;  %p691_p13 = scmp.lt.s32.totalorder %s897_s15, 4 }
  0x12   : > { %s140_s27 = sand.u32 1, %s893_s14   ;;  %s633_s28 = sshll.u32 %s897_s15, 9 }
  0x13   : > { %p988_p12 = pnand %p682_p11, %p1196_p5  ;;  %p997_p0 = pnand %p691_p13, %p966_p4 }
  0x14   : > { %s741_s5 = scalar_lea.hbm %s1193_s1, 512 }
  0x15   : > { %s1204_s29 = scalar_select %p997_p0, 1, 0 }
  0x16   : > { %p742_p1 = scmp.ne.s32.totalorder %s1193_s1, %s741_s5  ;;  %p743_p2 = pneg %p988_p12 }
  0x17   : > { %p748_p7 = scmp.lt.u32.totalorder %s741_s5, %s1193_s1 }
  0x18   : > { %p744_p3 = pnand %p743_p2, %p742_p1 }
  0x1a   : > { %p745_p6 = pneg %p744_p3 }
  0x1c   : > { %p750_p4 = pnand %p748_p7, %p745_p6 }
  0x1e   : > { %753 = shalt.err (!%p750_p4)
}
  0x1f   : > { %s754_s10 = scalar_lea.vmem %s127_s25, 512  ;;  %p762_p5 = scmp.lt.s32.totalorder %s127_s25, %s127_s25 }
  0x20   : > { %p755_p11 = scmp.ne.s32.totalorder %s127_s25, %s754_s10  ;;  %p763_p8 = scmp.lt.s32.totalorder %s754_s10, %s754_s10 }
  0x22   : > { %p757_p13 = pnand %p755_p11, %p743_p2  ;;  %p764_p10 = por %p763_p8, %p762_p5 }
  0x24   : > { %p758_p9 = pneg %p757_p13 }
  0x26   : > { %p765_p0 = pnand %p764_p10, %p758_p9 }
  0x28   : > { %768 = shalt.err (!%p765_p0)
}
  0x29   : > { %s900_s11 = smov 128   ;;  %s901_s12 = smov 8  }
  0x2a   : > { %685 = dma.hbm_to_vmem [thread:$0]  (!%p988_p12), %s1193_s1, 512, %s127_s25, [#allocation6], %s900_s11, %s900_s11, %s901_s12  }
  0x2b   : > { %s666_s19 = smul.u32 288, %s140_s27  ;;  %s1020_s30 = scalar_lea.hbm %s1192_s0, %s633_s28 }
  0x2c   : > { %s1024_s6 = scalar_lea.sflag [#allocation3], %s140_s27  ;;  %s769_s26 = scalar_lea.hbm %s1020_s30, 4608 }
  0x2d   : > { %s144_s4 = scalar_lea.vmem [#allocation2], %s666_s19  ;;  %p770_p5 = scmp.ne.s32.totalorder %s1020_s30, %s769_s26 }
  0x2e   : > { %s151_s5 = sshll.u32 %s144_s4, 4  ;;  %p1205_p8 = scmp.ne.s32.totalorder %s1204_s29, 0  ;;  %s1022_s5 = int_to_ptr.vmem [resolvable:$true] %s151_s5 }
  0x2f   : > { %s774_s7 = scalar_lea.hbm %s1192_s0, 18432  ;;  %p775_p0 = scmp.lt.u32.totalorder %s1020_s30, %s1192_s0 }
  0x30   : > { %p771_p9 = pneg %p1205_p8  ;;  %p776_p1 = scmp.lt.u32.totalorder %s774_s7, %s769_s26 }
  0x31   : > { %p778_p3 = scmp.lt.u32.totalorder %s769_s26, %s1020_s30 }
  0x32   : > { %p772_p10 = pnand %p771_p9, %p770_p5  ;;  %p777_p2 = por %p776_p1, %p775_p0 }
  0x34   : > { %p773_p12 = pneg %p772_p10  ;;  %p779_p6 = por %p778_p3, %p777_p2 }
  0x36   : > { %p780_p7 = pnand %p779_p6, %p773_p12 }
  0x38   : > { %783 = shalt.err (!%p780_p7)
}
  0x39   : > { %s784_s27 = scalar_lea.vmem %s1022_s5, 4608  ;;  %s902_s10 = smov [#allocation2]  }
  0x3a   : > { %p785_p4 = scmp.ne.s32.totalorder %s1022_s5, %s784_s27  ;;  %s789_s11 = sshll.u32 %s902_s10, 4  ;;  %s790_s11 = int_to_ptr.vmem [resolvable:$false] %s789_s11 }
  0x3b   : > { %s791_s12 = scalar_lea.vmem %s790_s11, 9216  ;;  %p792_p5 = scmp.lt.s32.totalorder %s1022_s5, %s790_s11 }
  0x3c   : > { %p787_p11 = pnand %p785_p4, %p771_p9  ;;  %p793_p10 = scmp.lt.s32.totalorder %s791_s12, %s784_s27 }
  0x3e   : > { %p788_p13 = pneg %p787_p11  ;;  %p794_p0 = por %p793_p10, %p792_p5 }
  0x40   : > { %p795_p1 = pnand %p794_p0, %p788_p13 }
  0x42   : > { %798 = shalt.err (!%p795_p1)
}
  0x43   : > { %s903_s15 = smov 2048   ;;  %s904_s18 = smov 512  }
  0x44   : > { %s905_s19 = smov 32   ;;  %p1206_p9 = scmp.ne.s32.totalorder %s1202_s23, 0 }
  0x45   : > { %689 = dma.hbm_to_vmem [thread:$0]  (!%p1205_p8), %s1020_s30, 4608, %s1022_s5, %s1024_s6, %s903_s15, %s904_s18, %s905_s19  }
  0x46   : > { %163 = sbr.rel (%p1206_p9) target bundleno = 529 (0x211), region = 28  ;;  %s165_s21 = sand.u32 (!%p1206_p9), 1, %s889_s13  }
  0x47   : > { %s667_s24 = smul.u32 (!%p1206_p9), 288, %s165_s21  ;;  %s166_s4 = scalar_lea.sflag (!%p1206_p9), [#allocation3], %s165_s21 }
  0x48   : > { %p1207_p12 = scmp.ne.s32.totalorder (!%p1206_p9), %s1201_s22, 0 }
  0x49   : > { %s1055_s26 = scalar_lea.vmem (!%p1206_p9), [#allocation2], %s667_s24 }
  0x4d   : > { %868 = dma.done.wait (%p1207_p12), %s166_s4, 4608  }
  0x4e   : > { %870 = vsyncadd (%p1207_p12), %s166_s4, 4294962688  ;;  %p1208_p2 = scmp.eq.s32.totalorder %s951_s16, 0 }
  0x50   : > { %872 = dma.done.wait (%p1208_p2), [#allocation6], 512   ;;  %p1209_p8 = pmov %p1208_p2 }
  0x51   : > { %p1210_p3 = scmp.ne.s32.totalorder %s951_s16, 0 }
  0x52   : > { %874 = vsyncadd (%p1209_p8), [#allocation6], 4294966784  ;;  %vm196_vm0 = vcmask (!%p1210_p3), 7168   ;;  %v906_v0 = vmov (!%p1210_p3), 0.0  }
  0x53   : > { %195 = sbr.rel (%p1210_p3) target bundleno = 90 (0x5a), region = 40  ;;  %197 = vst.msk [vmem:[#allocation7] sm:$0xff] (!%p1210_p3), %vm196_vm0, %v906_v0  ;;  %198 = vst.msk [vmem:[#allocation7 + $0x8] sm:$0xff] (!%p1210_p3), %vm196_vm0, %v906_v0 }
  0x54   : > { %199 = vst.msk [vmem:[#allocation7 + $0x10] sm:$0xff] (!%p1210_p3), %vm196_vm0, %v906_v0  ;;  %200 = vst.msk [vmem:[#allocation7 + $0x18] sm:$0xff] (!%p1210_p3), %vm196_vm0, %v906_v0 }
  0x55   : > { %201 = vst.msk [vmem:[#allocation8] sm:$0xff] (!%p1210_p3), %vm196_vm0, %v906_v0  ;;  %202 = vst.msk [vmem:[#allocation8 + $0x8] sm:$0xff] (!%p1210_p3), %vm196_vm0, %v906_v0 }
  0x56   : > { %203 = vst.msk [vmem:[#allocation8 + $0x10] sm:$0xff] (!%p1210_p3), %vm196_vm0, %v906_v0  ;;  %204 = vst.msk [vmem:[#allocation8 + $0x18] sm:$0xff] (!%p1210_p3), %vm196_vm0, %v906_v0 }
  0x5a PF: > { %v210_v1 = vld [vmem:[%s1055_s26 + $0x8] sm:$0xff]  ;;  %v209_v3 = vld [vmem:[%s1055_s26] sm:$0xff]  ;;  %v212_v6 = vld [vmem:[%s1055_s26 + $0x18] sm:$0xff]  ;;  %v907_v8 = vmov 0.0   ;;  %vm245_vm1 = vcmask 588800   ;;  %vm464_vm2 = vcmask 7168  }
  0x5b   : > { %v214_v2 = vld [vmem:[%s1055_s26 + $0x28] sm:$0xff]  ;;  %v213_v5 = vld [vmem:[%s1055_s26 + $0x20] sm:$0xff]  ;;  %v216_v7 = vld [vmem:[%s1055_s26 + $0x38] sm:$0xff]  ;;  %322 = vmatprep.mubr.f32.mxu0 %v907_v8  ;;  %411 = vmatprep.mubr.f32.mxu1 %v907_v8  ;;  %s908_s22 = smov [#allocation7]   ;;  %p693_p6 = scmp.eq.s32.totalorder %s951_s16, 3 }
  0x5c   : > { %v634_v4 = vpack.c.bf16 %v214_v2, %v210_v1  ;;  %v636_v9 = vpack.c.bf16 %v213_v5, %v209_v3  ;;  %v650_v10 = vpack.c.bf16 %v216_v7, %v212_v6  ;;  %v211_v11 = vld [vmem:[%s1055_s26 + $0x10] sm:$0xff]  ;;  %v218_v13 = vld [vmem:[%s1055_s26 + $0x48] sm:$0xff]  ;;  %v217_v16 = vld [vmem:[%s1055_s26 + $0x40] sm:$0xff]  ;;  %s523_s23 = sshll.u32 %s908_s22, 4  ;;  %s909_s29 = smov [#allocation8]   ;;  %s1125_s23 = int_to_ptr.vmem [resolvable:$true] %s523_s23 }
  0x5d   : > { %v215_v12 = vld [vmem:[%s1055_s26 + $0x30] sm:$0xff]  ;;  %v222_v15 = vld [vmem:[%s1055_s26 + $0x68] sm:$0xff]  ;;  %v221_v17 = vld [vmem:[%s1055_s26 + $0x60] sm:$0xff]  ;;  %s536_s30 = sshll.u32 %s909_s29, 4  ;;  %s799_s5 = scalar_lea.vmem %s1125_s23, 512  ;;  %s537_s30 = int_to_ptr.vmem [resolvable:$true] %s536_s30 }
  0x5e   : > { %635 = vmatprep.subr.bf16.mxu0 %v634_v4  ;;  %v652_v14 = vpack.c.bf16 %v215_v12, %v211_v11  ;;  %651 = vmatprep.subr.bf16.mxu1 %v650_v10  ;;  %v638_v18 = vpack.c.bf16 %v222_v15, %v218_v13  ;;  %v640_v19 = vpack.c.bf16 %v221_v17, %v217_v16  ;;  %v220_v20 = vld [vmem:[%s1055_s26 + $0x58] sm:$0xff]  ;;  %v219_v22 = vld [vmem:[%s1055_s26 + $0x50] sm:$0xff]  ;;  %v226_v25 = vld [vmem:[%s1055_s26 + $0x88] sm:$0xff]  ;;  %p800_p7 = scmp.ne.s32.totalorder %s1125_s23, %s799_s5  ;;  %p806_p13 = scmp.lt.s32.totalorder %s1125_s23, %s1125_s23 }
  0x5f   : > { %637 = vmatpush1.bf16.msra.mxu0 %v636_v9  ;;  %v224_v21 = vld [vmem:[%s1055_s26 + $0x78] sm:$0xff]  ;;  %v223_v24 = vld [vmem:[%s1055_s26 + $0x70] sm:$0xff]  ;;  %v230_v26 = vld [vmem:[%s1055_s26 + $0xa8] sm:$0xff]  ;;  %p807_p5 = scmp.lt.s32.totalorder %s799_s5, %s799_s5 }
  0x60   : > { %653 = vmatpush1.bf16.msra.mxu1 %v652_v14  ;;  %v654_v23 = vpack.c.bf16 %v224_v21, %v220_v20  ;;  %639 = vmatprep.subr.bf16.mxu0 %v638_v18  ;;  %v656_v27 = vpack.c.bf16 %v223_v24, %v219_v22  ;;  %v642_v28 = vpack.c.bf16 %v230_v26, %v226_v25  ;;  %v225_v29 = vld [vmem:[%s1055_s26 + $0x80] sm:$0xff]  ;;  %v228_v31 = vld [vmem:[%s1055_s26 + $0x98] sm:$0xff]  ;;  %v227_v33 = vld [vmem:[%s1055_s26 + $0x90] sm:$0xff]  ;;  %p801_p4 = pnand %p800_p7, %p693_p6 }
  0x61   : > { %v229_v30 = vld [vmem:[%s1055_s26 + $0xa0] sm:$0xff]  ;;  %v232_v32 = vld [vmem:[%s1055_s26 + $0xb8] sm:$0xff]  ;;  %v231_v34 = vld [vmem:[%s1055_s26 + $0xb0] sm:$0xff]  ;;  %p808_p10 = por %p807_p5, %p806_p13 }
  0x62   : > { %655 = vmatprep.subr.bf16.mxu1 %v654_v23  ;;  %v644_v35 = vpack.c.bf16 %v229_v30, %v225_v29  ;;  %v658_v36 = vpack.c.bf16 %v232_v32, %v228_v31  ;;  %v234_v37 = vld [vmem:[%s1055_s26 + $0xc8] sm:$0xff]  ;;  %v233_v39 = vld [vmem:[%s1055_s26 + $0xc0] sm:$0xff]  ;;  %v660_v40 = vpack.c.bf16 %v231_v34, %v227_v33  ;;  %v236_v43 = vld [vmem:[%s1055_s26 + $0xd8] sm:$0xff]  ;;  %p802_p11 = pneg %p801_p4 }
  0x63   : > { %641 = vmatpush1.bf16.msra.mxu0 %v640_v19  ;;  %v238_v38 = vld [vmem:[%s1055_s26 + $0xe8] sm:$0xff]  ;;  %v237_v42 = vld [vmem:[%s1055_s26 + $0xe0] sm:$0xff]  ;;  %v240_v44 = vld [vmem:[%s1055_s26 + $0xf8] sm:$0xff] }
  0x64   : > { %657 = vmatpush1.bf16.msra.mxu1 %v656_v27  ;;  %643 = vmatprep.subr.bf16.mxu0 %v642_v28  ;;  %v646_v41 = vpack.c.bf16 %v238_v38, %v234_v37  ;;  %v662_v45 = vpack.c.bf16 %v240_v44, %v236_v43  ;;  %v235_v46 = vld [vmem:[%s1055_s26 + $0xd0] sm:$0xff]  ;;  %v648_v48 = vpack.c.bf16 %v237_v42, %v233_v39  ;;  %v242_v50 = vld [vmem:[%s1055_s26 + $0x108] sm:$0xff]  ;;  %v244_v51 = vld [vmem:[%s1055_s26 + $0x118] sm:$0xff]  ;;  %p809_p0 = pnand %p808_p10, %p802_p11 }
  0x65   : > { %659 = vmatprep.subr.bf16.mxu1 %v658_v36  ;;  %v239_v47 = vld [vmem:[%s1055_s26 + $0xf0] sm:$0xff]  ;;  %v241_v52 = vld [vmem:[%s1055_s26 + $0x100] sm:$0xff]  ;;  %v206_v55 = vld [vmem:[#allocation5 + $0x8] sm:$0xff] }
  0x66   : > { %v664_v49 = vpack.c.bf16 %v239_v47, %v235_v46  ;;  %v205_v53 = vld [vmem:[#allocation5] sm:$0xff]  ;;  %v243_v54 = vld [vmem:[%s1055_s26 + $0x110] sm:$0xff]  ;;  %v208_v57 = vld [vmem:[#allocation5 + $0x18] sm:$0xff] }
  0x67   : > { %645 = vmatpush1.bf16.msra.mxu0 %v644_v35  ;;  %v207_v56 = vld [vmem:[#allocation5 + $0x10] sm:$0xff] }
  0x68   : > { %661 = vmatpush1.bf16.msra.mxu1 %v660_v40  ;;  %647 = vmatprep.subr.bf16.mxu0 %v646_v41 }
  0x69   : > { %663 = vmatprep.subr.bf16.mxu1 %v662_v45 }
  0x6b   : > { %649 = vmatpush1.bf16.msra.mxu0 %v648_v48 }
  0x6c   : > { %665 = vmatpush1.bf16.msra.mxu1 %v664_v49  ;;  %274 = vmatprep.subr.mxu0 %v242_v50  ;;  %v436_v50 = vld [vmem:[#allocation7] sm:$0xff] }
  0x6d   : > { %363 = vmatprep.subr.mxu1 %v244_v51 }
  0x6f   : > { %275 = vmatpush1.msra.mxu0 %v241_v52 }
  0x70   : > { %619 = vmatmul.mubr.msk.f32.vlgmr.msra.gmra.mrb[0].mxu0 %vm245_vm1, %v205_v53  ;;  %364 = vmatpush1.msra.mxu1 %v243_v54 }
  0x71   : > { %623 = vmatmul.mubr.msk.f32.vlgmr.msra.gmra.mrb[0].mxu1 %vm245_vm1, %v205_v53  ;;  %328 = vmatprep.mubr.f32.mxu0 %v907_v8  ;;  %v469_v53 = vld [vmem:[#allocation8] sm:$0xff] }
  0x72   : > { %417 = vmatprep.mubr.f32.mxu1 %v907_v8 }
  0x74   : > { %620 = vmatmul.mubr.msk.f32.gmra.mrb[2].mxu0 %vm245_vm1, %v206_v55 }
  0x75   : > { %624 = vmatmul.mubr.msk.f32.gmra.mrb[2].mxu1 %vm245_vm1, %v206_v55  ;;  %334 = vmatprep.mubr.f32.mxu0 %v907_v8  ;;  %v470_v55 = vld [vmem:[#allocation8 + $0x8] sm:$0xff] }
  0x76   : > { %423 = vmatprep.mubr.f32.mxu1 %v907_v8 }
  0x78   : > { %621 = vmatmul.mubr.msk.f32.gmra.mrb[4].mxu0 %vm245_vm1, %v207_v56 }
  0x79   : > { %340 = vmatprep.mubr.f32.mxu0 %v907_v8  ;;  %625 = vmatmul.mubr.msk.f32.gmra.mrb[4].mxu1 %vm245_vm1, %v207_v56 }
  0x7a   : > { %429 = vmatprep.mubr.f32.mxu1 %v907_v8 }
  0x7c   : > { %622 = vmatmul.mubr.msk.f32.gmra.mrb[6].mxu0 %vm245_vm1, %v208_v57 }
  0x7d   : > { %626 = vmatmul.mubr.msk.f32.gmra.mrb[6].mxu1 %vm245_vm1, %v208_v57 }
 0x143   : > { %v324_v58 = vpop.f32.mrb[0].mxu0 }
 0x144   : > { %v473_v59 = vmul.f32 %v324_v58, %v324_v58  ;;  %v326_v60 = vpop.f32.mrb[1].mxu0  ;;  %v413_v61 = vpop.f32.mrb[0].mxu1 }
 0x145   : > { %v440_v62 = vadd.f32 %v326_v60, %v324_v58  ;;  %v474_v63 = vmul.f32 %v326_v60, %v326_v60  ;;  %v415_v0 = vpop.f32.mrb[1].mxu1  ;;  %v475_v1 = vmul.f32 %v413_v61, %v413_v61  ;;  %v437_v58 = vld [vmem:[#allocation7 + $0x8] sm:$0xff] }
 0x146   : > { %v476_v13 = vmul.f32 %v415_v0, %v415_v0 }
 0x147   : > { %v489_v2 = vadd.f32 %v474_v63, %v473_v59  ;;  %v441_v3 = vadd.f32 %v440_v62, %v413_v61  ;;  %v330_v4 = vpop.f32.mrb[2].mxu0  ;;  %v438_v61 = vld [vmem:[#allocation7 + $0x10] sm:$0xff] }
 0x148   : > { %v477_v5 = vmul.f32 %v330_v4, %v330_v4  ;;  %v332_v6 = vpop.f32.mrb[3].mxu0  ;;  %v419_v7 = vpop.f32.mrb[2].mxu1 }
 0x149   : > { %v445_v9 = vadd.f32 %v332_v6, %v330_v4  ;;  %v478_v8 = vmul.f32 %v332_v6, %v332_v6  ;;  %v479_v10 = vmul.f32 %v419_v7, %v419_v7  ;;  %v421_v11 = vpop.f32.mrb[3].mxu1  ;;  %v442_v12 = vadd.f32 %v441_v3, %v415_v0  ;;  %v471_v0 = vld [vmem:[#allocation8 + $0x10] sm:$0xff]  ;;  %v439_v3 = vld [vmem:[#allocation7 + $0x18] sm:$0xff] }
 0x14a   : > { %v490_v14 = vadd.f32 %v489_v2, %v475_v1  ;;  %v480_v22 = vmul.f32 %v421_v11, %v421_v11 }
 0x14b   : > { %v494_v15 = vadd.f32 %v478_v8, %v477_v5  ;;  %v446_v16 = vadd.f32 %v445_v9, %v419_v7  ;;  %443 = vadd.xlane.f32.xlu0 %v442_v12  ;;  %v336_v17 = vpop.f32.mrb[4].mxu0  ;;  %v472_v7 = vld [vmem:[#allocation8 + $0x18] sm:$0xff] }
 0x14c   : > { %v481_v18 = vmul.f32 %v336_v17, %v336_v17  ;;  %v338_v19 = vpop.f32.mrb[5].mxu0  ;;  %v425_v20 = vpop.f32.mrb[4].mxu1  ;;  %v491_v21 = vadd.f32 %v490_v14, %v476_v13 }
 0x14d   : > { %v450_v23 = vadd.f32 %v338_v19, %v336_v17  ;;  %v482_v24 = vmul.f32 %v338_v19, %v338_v19  ;;  %v427_v25 = vpop.f32.mrb[5].mxu1  ;;  %v495_v26 = vadd.f32 %v494_v15, %v479_v10  ;;  %v483_v27 = vmul.f32 %v425_v20, %v425_v20 }
 0x14e   : > { %v447_v28 = vadd.f32 %v446_v16, %v421_v11  ;;  %v484_v35 = vmul.f32 %v427_v25, %v427_v25 }
 0x14f   : > { %v499_v29 = vadd.f32 %v482_v24, %v481_v18  ;;  %v451_v30 = vadd.f32 %v450_v23, %v425_v20  ;;  %492 = vadd.xlane.f32.xlu0 %v491_v21  ;;  %v342_v31 = vpop.f32.mrb[6].mxu0  ;;  %v496_v32 = vadd.f32 %v495_v26, %v480_v22 }
 0x150   : > { %v485_v33 = vmul.f32 %v342_v31, %v342_v31  ;;  %v344_v34 = vpop.f32.mrb[7].mxu0  ;;  %v431_v36 = vpop.f32.mrb[6].mxu1 }
 0x151   : > { %v455_v37 = vadd.f32 %v344_v34, %v342_v31  ;;  %v486_v38 = vmul.f32 %v344_v34, %v344_v34  ;;  %497 = vadd.xlane.f32.xlu1 %v496_v32  ;;  %v487_v39 = vmul.f32 %v431_v36, %v431_v36  ;;  %v433_v40 = vpop.f32.mrb[7].mxu1  ;;  %v452_v41 = vadd.f32 %v451_v30, %v427_v25 }
 0x152   : > { %v500_v42 = vadd.f32 %v499_v29, %v483_v27  ;;  %v488_v45 = vmul.f32 %v433_v40, %v433_v40 }
 0x153   : > { %v504_v43 = vadd.f32 %v486_v38, %v485_v33  ;;  %v456_v44 = vadd.f32 %v455_v37, %v431_v36  ;;  %448 = vadd.xlane.f32.xlu0 %v447_v28 }
 0x154   : > { %v501_v46 = vadd.f32 %v500_v42, %v484_v35 }
 0x155   : > { %v457_v47 = vadd.f32 %v456_v44, %v433_v40  ;;  %453 = vadd.xlane.f32.xlu1 %v452_v41  ;;  %v505_v48 = vadd.f32 %v504_v43, %v487_v39 }
 0x157   : > { %502 = vadd.xlane.f32.xlu0 %v501_v46  ;;  %v506_v49 = vadd.f32 %v505_v48, %v488_v45 }
 0x159   : > { %458 = vadd.xlane.f32.xlu1 %v457_v47 }
 0x15d   : > { %507 = vadd.xlane.f32.xlu1 %v506_v49 }
 0x1d8   : > { %v444_v51 = vpop.xlane.xlu0 %443 }
 0x1d9   : > { %v460_v52 = vadd.f32 %v444_v51, %v436_v50 }
 0x1db   : > { %465 = vst.msk [vmem:[#allocation7] sm:$0xff] %vm464_vm2, %v460_v52 }
 0x1dc   : > { %v493_v54 = vpop.xlane.xlu0 %492 }
 0x1dd   : > { %v509_v56 = vadd.f32 %v493_v54, %v469_v53 }
 0x1de   : > { %v498_v57 = vpop.xlane.xlu1 %497 }
 0x1df   : > { %513 = vst.msk [vmem:[#allocation8] sm:$0xff] %vm464_vm2, %v509_v56  ;;  %v510_v59 = vadd.f32 %v498_v57, %v470_v55 }
 0x1e0   : > { %v449_v60 = vpop.xlane.xlu0 %448 }
 0x1e1   : > { %514 = vst.msk [vmem:[#allocation8 + $0x8] sm:$0xff] %vm464_vm2, %v510_v59  ;;  %v461_v62 = vadd.f32 %v449_v60, %v437_v58 }
 0x1e2   : > { %v454_v63 = vpop.xlane.xlu1 %453 }
 0x1e3   : > { %466 = vst.msk [vmem:[#allocation7 + $0x8] sm:$0xff] %vm464_vm2, %v461_v62  ;;  %v462_v1 = vadd.f32 %v454_v63, %v438_v61 }
 0x1e4   : > { %v503_v2 = vpop.xlane.xlu0 %502 }
 0x1e5   : > { %467 = vst.msk [vmem:[#allocation7 + $0x10] sm:$0xff] %vm464_vm2, %v462_v1  ;;  %v511_v4 = vadd.f32 %v503_v2, %v471_v0 }
 0x1e6   : > { %v459_v5 = vpop.xlane.xlu1 %458 }
 0x1e7   : > { %515 = vst.msk [vmem:[#allocation8 + $0x10] sm:$0xff] %vm464_vm2, %v511_v4  ;;  %v463_v6 = vadd.f32 %v459_v5, %v439_v3 }
 0x1e9   : > { %468 = vst.msk [vmem:[#allocation7 + $0x18] sm:$0xff] %vm464_vm2, %v463_v6 }
 0x1ea   : > { %v508_v9 = vpop.xlane.xlu1 %507 }
 0x1eb   : > { %812 = shalt.err (!%p809_p0)
}
 0x1ec   : > { %s813_s28 = scalar_lea.hbm %s1194_s2, 512 }
 0x1ed   : > { %p814_p1 = scmp.ne.s32.totalorder %s1194_s2, %s813_s28  ;;  %p819_p2 = scmp.lt.u32.totalorder %s813_s28, %s1194_s2 }
 0x1ef   : > { %p815_p9 = pnand %p814_p1, %p693_p6 }
 0x1f1   : > { %p816_p12 = pneg %p815_p9 }
 0x1f3   : > { %p821_p8 = pnand %p819_p2, %p816_p12 }
 0x1f5   : > { %824 = shalt.err (!%p821_p8)
}
 0x1f6   : > { %s910_s10 = smov 128   ;;  %s911_s11 = smov 8   ;;  %v512_v8 = vadd.f32 %v508_v9, %v472_v7 }
 0x1f7   : > { %675 = dma.vmem_to_hbm [thread:$0]  (%p693_p6), %s1125_s23, 512, %s1194_s2, [#allocation4], %s910_s10, %s910_s10, %s911_s11  }
 0x1f8   : > { %516 = vst.msk [vmem:[#allocation8 + $0x18] sm:$0xff] %vm464_vm2, %v512_v8  ;;  %s825_s18 = scalar_lea.vmem %s537_s30, 512  ;;  %p832_p11 = scmp.lt.s32.totalorder %s537_s30, %s537_s30 }
 0x1f9   : > { %p826_p3 = scmp.ne.s32.totalorder %s537_s30, %s825_s18  ;;  %p833_p13 = scmp.lt.s32.totalorder %s825_s18, %s825_s18 }
 0x1fb   : > { %p827_p7 = pnand %p826_p3, %p693_p6  ;;  %p834_p5 = por %p833_p13, %p832_p11 }
 0x1fd   : > { %p828_p4 = pneg %p827_p7 }
 0x1ff   : > { %p835_p10 = pnand %p834_p5, %p828_p4 }
 0x201   : > { %838 = shalt.err (!%p835_p10)
}
 0x202   : > { %s839_s24 = scalar_lea.hbm %s1195_s3, 512 }
 0x203   : > { %p840_p0 = scmp.ne.s32.totalorder %s1195_s3, %s839_s24  ;;  %p845_p12 = scmp.lt.u32.totalorder %s839_s24, %s1195_s3 }
 0x205   : > { %p841_p1 = pnand %p840_p0, %p693_p6 }
 0x207   : > { %p842_p9 = pneg %p841_p1 }
 0x209   : > { %p847_p2 = pnand %p845_p12, %p842_p9 }
 0x20b   : > { %850 = shalt.err (!%p847_p2)
}
 0x20c   : > { %677 = dma.vmem_to_hbm [thread:$0]  (%p693_p6), %s537_s30, 512, %s1195_s3, [#allocation9], %s910_s10, %s910_s10, %s911_s11  }
 0x20d   : > { %876 = dma.done.wait (%p693_p6), [#allocation4], 512  }
 0x20e   : > { %878 = vsyncadd (%p693_p6), [#allocation4], 4294966784 }
 0x20f   : > { %880 = dma.done.wait (%p693_p6), [#allocation9], 512  }
 0x210   : > { %882 = vsyncadd (%p693_p6), [#allocation9], 4294966784 }
 0x211 PF: > { %p17_p8 = scmp.ge.s32.totalorder %s954_s17, 6   ;;  %s1211_s12 = smov %s889_s13 }
 0x212   : > { %s1212_s13 = smov %s893_s14  ;;  %s1213_s14 = smov %s964_s20 }
 0x213   : > { %s1214_s15 = smov %s954_s17  ;;  %19 = sbr.rel (!%p17_p8) target bundleno = 6 (0x6), region = 81 }
 0x21a   :  { %556 = vsyncpa [#allocation3], 1 }
 0x21b   :  { %558 = vsyncpa [#allocation3 + $0x1], 1 }
 0x21c   :  { %559 = vsyncpa [#allocation6], 1 }
 0x21d   :  { %560 = vsyncpa [#allocation4], 1 }
 0x21e   :  { %562 = vsyncpa [#allocation4 + $0x1], 1 }
 0x21f   :  { %563 = vsyncpa [#allocation9], 1 }

// kernel: decoder_part_forward.3
= control target key start
LH: loop header
LB: loop body
LE: loop exit
PB: predicated region body
PF: predicated region fallthrough
CT: control target
= control target key end

     0   :  { %s2029_s0 = inlined_call_operand.hbm [shape: f32[72,2048], index: 0, kind: input, shape index: {}]   ;;  %s2030_s1 = inlined_call_operand.hbm [shape: f32[32,72], index: 1, kind: input, shape index: {}]   ;;  %s2031_s2 = inlined_call_operand.hbm [shape: f32[32,1], index: 2, kind: input, shape index: {}]   ;;  %s2032_s3 = inlined_call_operand.hbm [shape: f32[32,1], index: 3, kind: input, shape index: {}]   ;;  %s2033_s4 = inlined_call_operand.hbm [shape: f32[8,32], index: 4, kind: input, shape index: {}]   ;;  %s2034_s5 = inlined_call_operand.hbm [shape: f32[8,1], index: 5, kind: input, shape index: {}]   ;;  %s2035_s6 = inlined_call_operand.hbm [shape: f32[8,2048], index: 6, kind: output, shape index: {}]  }
   0x1   :  { %2039 = sst [smem:[#allocation19_spill]] %s2030_s1 }
   0x2   :  { %11 = vsyncpa [#allocation3], 0 }
   0x3   :  { %13 = vsyncpa [#allocation3 + $0x1], 0 }
   0x4   :  { %14 = vsyncpa [#allocation6], 0 }
   0x5   :  { %15 = vsyncpa [#allocation9], 0 }
   0x6   :  { %16 = vsyncpa [#allocation12], 0 }
   0x7   :  { %17 = vsyncpa [#allocation4], 0 }
   0x8   :  { %19 = vsyncpa [#allocation4 + $0x1], 0  ;;  %s1575_s21 = smov 0   ;;  %s1577_s22 = smov 0  }
   0x9   :  { %s1579_s23 = smov 0   ;;  %s1581_s24 = smov 0  }
   0xa LB: > { %s1596_s25 = sadd.s32 4294967295, %s1524_s24   ;;  %s1038_s26 = sadd.s32 4294967294, %s1524_s24   ;;  %s1524_s24 = sphi %s1581_s24, %s2061_s24   ;;  %s1520_s23 = sphi %s1579_s23, %s2060_s23   ;;  %s1516_s22 = sphi %s1577_s22, %s2059_s22   ;;  %s1512_s21 = sphi %s1575_s21, %s2058_s21  }
   0xb   : > { %p45_p0 = scmp.ne.s32.totalorder %s1516_s22, %s1512_s21  ;;  %p2036_p1 = scmp.eq.s32.totalorder %s1596_s25, 0 }
   0xc   : > { %p180_p3 = scmp.eq.s32.totalorder %s1038_s26, 3  ;;  %p1039_p5 = scmp.ge.s32.totalorder %s1524_s24, 1 }
   0xd   : > { %p1605_p4 = por %p2036_p1, %p45_p0  ;;  %p187_p7 = scmp.lt.s32.totalorder %s1524_s24, 5 }
   0xe   : > { %p1610_p6 = por %p180_p3, %p45_p0  ;;  %s1526_s30 = smov [#allocation5]  }
   0xf   : > { %s2040_s27 = scalar_select %p1605_p4, 1, 0 }
  0x10   : > { %s2041_s28 = scalar_select %p1610_p6, 1, 0 }
  0x11   : > { %p1615_p8 = pnand %p1039_p5, %p187_p7  ;;  %s199_s7 = sshll.u32 %s1526_s30, 4  ;;  %s1619_s7 = int_to_ptr.vmem [resolvable:$true] %s199_s7 }
  0x12   : > { %s1527_s9 = smov [#allocation8]   ;;  %s1528_s11 = smov [#allocation7]  }
  0x13   : > { %s2042_s29 = scalar_select %p1615_p8, 1, 0 }
  0x14   : > { %p1162_p9 = pneg %p1615_p8  ;;  %s225_s10 = sshll.u32 %s1527_s9, 4  ;;  %s1629_s10 = int_to_ptr.vmem [resolvable:$true] %s225_s10 }
  0x15   : > { %s1631_s12 = sshll.u32 %s1528_s11, 4  ;;  %s2044_s1 = sld [smem:[#allocation19_spill]]  ;;  %s213_s12 = int_to_ptr.vmem [resolvable:$true] %s1631_s12 }
  0x16   : > { %p1625_p10 = pnand %p1162_p9, %p2036_p1 }
  0x18   : > { %p1641_p12 = pneg %p1625_p10 }
  0x1b   : > { %s1276_s15 = scalar_lea.hbm %s2044_s1, 512 }
  0x1c   : > { %p1277_p11 = scmp.ne.s32.totalorder %s2044_s1, %s1276_s15  ;;  %p1283_p3 = scmp.lt.u32.totalorder %s1276_s15, %s2044_s1 }
  0x1e   : > { %p1279_p13 = pnand %p1641_p12, %p1277_p11 }
  0x20   : > { %p1280_p0 = pneg %p1279_p13 }
  0x22   : > { %p1285_p5 = pnand %p1283_p3, %p1280_p0 }
  0x24   : > { %1288 = shalt.err (!%p1285_p5)
}
  0x25   : > { %s1289_s26 = scalar_lea.vmem %s1619_s7, 512  ;;  %p1297_p2 = scmp.lt.s32.totalorder %s1619_s7, %s1619_s7 }
  0x26   : > { %p1290_p7 = scmp.ne.s32.totalorder %s1619_s7, %s1289_s26  ;;  %p1298_p6 = scmp.lt.s32.totalorder %s1289_s26, %s1289_s26 }
  0x28   : > { %p1292_p9 = pnand %p1290_p7, %p1641_p12  ;;  %p1299_p11 = por %p1298_p6, %p1297_p2 }
  0x2a   : > { %p1293_p1 = pneg %p1292_p9 }
  0x2c   : > { %p1300_p13 = pnand %p1299_p11, %p1293_p1 }
  0x2e   : > { %1303 = shalt.err (!%p1300_p13)
}
  0x2f   : > { %s1529_s30 = smov 128   ;;  %s1530_s9 = smov 8  }
  0x30   : > { %1165 = dma.hbm_to_vmem [thread:$0]  (!%p1625_p10), %s2044_s1, 512, %s1619_s7, [#allocation6], %s1529_s30, %s1529_s30, %s1530_s9  }
  0x31   : > { %s1304_s16 = scalar_lea.hbm %s2032_s3, 512 }
  0x32   : > { %p1305_p1 = scmp.ne.s32.totalorder %s2032_s3, %s1304_s16  ;;  %p1311_p0 = scmp.lt.u32.totalorder %s1304_s16, %s2032_s3 }
  0x34   : > { %p1307_p2 = pnand %p1305_p1, %p1641_p12 }
  0x36   : > { %p1308_p6 = pneg %p1307_p2 }
  0x38   : > { %p1313_p3 = pnand %p1311_p0, %p1308_p6 }
  0x3a   : > { %1316 = shalt.err (!%p1313_p3)
}
  0x3b   : > { %s1317_s7 = scalar_lea.vmem %s1629_s10, 512  ;;  %p1325_p11 = scmp.lt.s32.totalorder %s1629_s10, %s1629_s10 }
  0x3c   : > { %p1318_p5 = scmp.ne.s32.totalorder %s1629_s10, %s1317_s7  ;;  %p1326_p13 = scmp.lt.s32.totalorder %s1317_s7, %s1317_s7 }
  0x3e   : > { %p1320_p7 = pnand %p1318_p5, %p1641_p12  ;;  %p1327_p1 = por %p1326_p13, %p1325_p11 }
  0x40   : > { %p1321_p9 = pneg %p1320_p7 }
  0x42   : > { %p1328_p2 = pnand %p1327_p1, %p1321_p9 }
  0x44   : > { %1331 = shalt.err (!%p1328_p2)
}
  0x45   : > { %1171 = dma.hbm_to_vmem [thread:$0]  (!%p1625_p10), %s2032_s3, 512, %s1629_s10, [#allocation9], %s1529_s30, %s1529_s30, %s1530_s9  }
  0x46   : > { %s1332_s16 = scalar_lea.hbm %s2031_s2, 512 }
  0x47   : > { %p1333_p6 = scmp.ne.s32.totalorder %s2031_s2, %s1332_s16  ;;  %p1339_p5 = scmp.lt.u32.totalorder %s1332_s16, %s2031_s2 }
  0x49   : > { %p1335_p0 = pnand %p1333_p6, %p1641_p12 }
  0x4b   : > { %p1336_p3 = pneg %p1335_p0 }
  0x4d   : > { %p1341_p7 = pnand %p1339_p5, %p1336_p3 }
  0x4f   : > { %1344 = shalt.err (!%p1341_p7)
}
  0x50   : > { %s1345_s7 = scalar_lea.vmem %s213_s12, 512  ;;  %p1353_p1 = scmp.lt.s32.totalorder %s213_s12, %s213_s12 }
  0x51   : > { %p1346_p9 = scmp.ne.s32.totalorder %s213_s12, %s1345_s7  ;;  %p1354_p2 = scmp.lt.s32.totalorder %s1345_s7, %s1345_s7 }
  0x53   : > { %p1348_p11 = pnand %p1346_p9, %p1641_p12  ;;  %p1355_p4 = por %p1354_p2, %p1353_p1 }
  0x55   : > { %p1349_p13 = pneg %p1348_p11 }
  0x57   : > { %p1356_p8 = pnand %p1355_p4, %p1349_p13 }
  0x59   : > { %1359 = shalt.err (!%p1356_p8)
}
  0x5a   : > { %1168 = dma.hbm_to_vmem [thread:$0]  (!%p1625_p10), %s2031_s2, 512, %s213_s12, [#allocation6], %s1529_s30, %s1529_s30, %s1530_s9  }
  0x5b   : > { %s1531_s13 = smov [#allocation10]   ;;  %s1532_s15 = smov [#allocation11]  }
  0x5c   : > { %s239_s14 = sshll.u32 %s1531_s13, 4  ;;  %s250_s16 = sshll.u32 %s1532_s15, 4  ;;  %s240_s14 = int_to_ptr.vmem [resolvable:$true] %s239_s14  ;;  %s251_s16 = int_to_ptr.vmem [resolvable:$true] %s250_s16 }
  0x5d   : > { %s1360_s20 = scalar_lea.hbm %s2033_s4, 128 }
  0x5e   : > { %p1361_p4 = scmp.ne.s32.totalorder %s2033_s4, %s1360_s20  ;;  %p1367_p0 = scmp.lt.u32.totalorder %s1360_s20, %s2033_s4 }
  0x60   : > { %p1363_p8 = pnand %p1361_p4, %p1641_p12 }
  0x62   : > { %p1364_p6 = pneg %p1363_p8 }
  0x64   : > { %p1369_p3 = pnand %p1367_p0, %p1364_p6 }
  0x66   : > { %1372 = shalt.err (!%p1369_p3)
}
  0x67   : > { %s1373_s12 = scalar_lea.vmem %s240_s14, 128  ;;  %p1381_p11 = scmp.lt.s32.totalorder %s240_s14, %s240_s14 }
  0x68   : > { %p1374_p5 = scmp.ne.s32.totalorder %s240_s14, %s1373_s12  ;;  %p1382_p13 = scmp.lt.s32.totalorder %s1373_s12, %s1373_s12 }
  0x6a   : > { %p1376_p7 = pnand %p1374_p5, %p1641_p12  ;;  %p1383_p1 = por %p1382_p13, %p1381_p11 }
  0x6c   : > { %p1377_p9 = pneg %p1376_p7 }
  0x6e   : > { %p1384_p2 = pnand %p1383_p1, %p1377_p9 }
  0x70   : > { %1387 = shalt.err (!%p1384_p2)
}
  0x71   : > { %1174 = dma.hbm_to_vmem [thread:$0]  (!%p1625_p10), %s2033_s4, 128, %s240_s14, [#allocation9]  }
  0x72   : > { %s1388_s13 = scalar_lea.hbm %s2034_s5, 128 }
  0x73   : > { %p1389_p4 = scmp.ne.s32.totalorder %s2034_s5, %s1388_s13  ;;  %p1395_p0 = scmp.lt.u32.totalorder %s1388_s13, %s2034_s5 }
  0x75   : > { %p1391_p8 = pnand %p1389_p4, %p1641_p12 }
  0x77   : > { %p1392_p6 = pneg %p1391_p8 }
  0x79   : > { %p1397_p3 = pnand %p1395_p0, %p1392_p6 }
  0x7b   : > { %1400 = shalt.err (!%p1397_p3)
}
  0x7c   : > { %s1401_s26 = scalar_lea.vmem %s251_s16, 128  ;;  %p1409_p11 = scmp.lt.s32.totalorder %s251_s16, %s251_s16 }
  0x7d   : > { %p1402_p5 = scmp.ne.s32.totalorder %s251_s16, %s1401_s26  ;;  %p1410_p13 = scmp.lt.s32.totalorder %s1401_s26, %s1401_s26 }
  0x7f   : > { %p1404_p7 = pnand %p1402_p5, %p1641_p12  ;;  %p1411_p1 = por %p1410_p13, %p1409_p11 }
  0x81   : > { %p1405_p9 = pneg %p1404_p7 }
  0x83   : > { %p1412_p2 = pnand %p1411_p1, %p1405_p9 }
  0x85   : > { %1415 = shalt.err (!%p1412_p2)
}
  0x86   : > { %1177 = dma.hbm_to_vmem [thread:$0]  (!%p1625_p10), %s2034_s5, 128, %s251_s16, [#allocation12]  }
  0x87   : > { %s1750_s18 = sadd.s32 1, %s1524_s24   ;;  %s32_s8 = sadd.s32 1, %s1520_s23 }
  0x88   : > { %s29_s10 = ssub.s32 %s1524_s24, %s1750_s18  ;;  %p39_p4 = scmp.ne.s32.totalorder %s1520_s23, %s1516_s22 }
  0x89   : > { %p30_p12 = scmp.eq.s32.totalorder %s29_s10, 0  ;;  %p40_p8 = scmp.eq.s32.totalorder %s1524_s24, 0 }
  0x8a   : > { %p1191_p6 = scmp.lt.s32.totalorder %s1524_s24, 4  ;;  %p2046_p3 = scmp.eq.s32.totalorder %s1596_s25, 3 }
  0x8b   : > { %s1760_s12 = scalar_select %p30_p12, %s1520_s23, %s32_s8  }
  0x8c   : > { %p41_p0 = por %p40_p8, %p39_p4  ;;  %p1764_p5 = por %p2046_p3, %p39_p4 }
  0x8d   : > { %s261_s9 = sand.u32 1, %s1520_s23   ;;  %s1086_s1 = sshll.u32 %s1524_s24, 9 }
  0x8e   : > { %s1136_s16 = smul.u32 288, %s261_s9  ;;  %s1773_s15 = scalar_lea.hbm %s2029_s0, %s1086_s1 }
  0x8f   : > { %p1775_p10 = pnand %p1191_p6, %p41_p0  ;;  %s1781_s26 = scalar_lea.sflag [#allocation3], %s261_s9 }
  0x90   : > { %s265_s19 = scalar_lea.vmem [#allocation2], %s1136_s16  ;;  %s1416_s14 = scalar_lea.hbm %s1773_s15, 4608 }
  0x91   : > { %s272_s20 = sshll.u32 %s265_s19, 4  ;;  %p1417_p7 = scmp.ne.s32.totalorder %s1773_s15, %s1416_s14  ;;  %s1779_s20 = int_to_ptr.vmem [resolvable:$true] %s272_s20 }
  0x92   : > { %p1418_p9 = pneg %p1775_p10  ;;  %s1421_s8 = scalar_lea.hbm %s2029_s0, 18432 }
  0x93   : > { %p1422_p1 = scmp.lt.u32.totalorder %s1773_s15, %s2029_s0  ;;  %p1423_p2 = scmp.lt.u32.totalorder %s1421_s8, %s1416_s14 }
  0x94   : > { %p1419_p11 = pnand %p1418_p9, %p1417_p7  ;;  %p1425_p4 = scmp.lt.u32.totalorder %s1416_s14, %s1773_s15 }
  0x95   : > { %p1424_p12 = por %p1423_p2, %p1422_p1 }
  0x96   : > { %p1420_p13 = pneg %p1419_p11 }
  0x97   : > { %p1426_p8 = por %p1425_p4, %p1424_p12 }
  0x99   : > { %p1427_p6 = pnand %p1426_p8, %p1420_p13 }
  0x9b   : > { %1430 = shalt.err (!%p1427_p6)
}
  0x9c   : > { %s1431_s9 = scalar_lea.vmem %s1779_s20, 4608  ;;  %s1533_s16 = smov [#allocation2]  }
  0x9d   : > { %p1432_p0 = scmp.ne.s32.totalorder %s1779_s20, %s1431_s9  ;;  %s1436_s13 = sshll.u32 %s1533_s16, 4  ;;  %s1437_s13 = int_to_ptr.vmem [resolvable:$false] %s1436_s13 }
  0x9e   : > { %s1438_s19 = scalar_lea.vmem %s1437_s13, 9216  ;;  %p1439_p11 = scmp.lt.s32.totalorder %s1779_s20, %s1437_s13 }
  0x9f   : > { %p1434_p3 = pnand %p1432_p0, %p1418_p9  ;;  %p1440_p1 = scmp.lt.s32.totalorder %s1438_s19, %s1431_s9 }
  0xa1   : > { %p1435_p7 = pneg %p1434_p3  ;;  %p1441_p2 = por %p1440_p1, %p1439_p11 }
  0xa3   : > { %p1442_p12 = pnand %p1441_p2, %p1435_p7 }
  0xa5   : > { %1445 = shalt.err (!%p1442_p12)
}
  0xa6   : > { %s1534_s14 = smov 2048   ;;  %s1535_s7 = smov 512  }
  0xa7   : > { %s1536_s10 = smov 32   ;;  %p2049_p9 = scmp.ne.s32.totalorder %s2042_s29, 0 }
  0xa8   : > { %1181 = dma.hbm_to_vmem [thread:$0]  (!%p1775_p10), %s1773_s15, 4608, %s1779_s20, %s1781_s26, %s1534_s14, %s1535_s7, %s1536_s10  }
  0xa9   : > { %284 = sbr.rel (%p2049_p9) target bundleno = 699 (0x2bb), region = 44  ;;  %s1812_s8 = sand.u32 (!%p2049_p9), 1, %s1516_s22  }
  0xaa   : > { %s1137_s1 = smul.u32 (!%p2049_p9), 288, %s1812_s8  ;;  %s287_s11 = scalar_lea.sflag (!%p2049_p9), [#allocation3], %s1812_s8 }
  0xab   : > { %p2050_p13 = scmp.ne.s32.totalorder (!%p2049_p9), %s2040_s27, 0 }
  0xac   : > { %s1816_s9 = scalar_lea.vmem (!%p2049_p9), [#allocation2], %s1137_s1 }
  0xb0   : > { %1491 = dma.done.wait (%p2050_p13), %s287_s11, 4608  }
  0xb1   : > { %1493 = vsyncadd (%p2050_p13), %s287_s11, 4294962688  ;;  %p2051_p10 = scmp.eq.s32.totalorder %s1596_s25, 0 }
  0xb3   : > { %1495 = dma.done.wait (%p2051_p10), [#allocation6], 1024   ;;  %p2052_p4 = pmov %p2051_p10 }
  0xb5   : > { %1497 = vsyncadd (%p2052_p4), [#allocation6], 4294966272  ;;  %p2053_p8 = pmov %p2052_p4 }
  0xb6   : > { %p2054_p6 = pmov %p2052_p4 }
  0xb7   : > { %1499 = dma.done.wait (%p2053_p8), [#allocation9], 640  }
  0xb8   : > { %1501 = vsyncadd (%p2054_p6), [#allocation9], 4294966656  ;;  %p2055_p0 = pmov %p2052_p4 }
  0xba   : > { %1503 = dma.done.wait (%p2055_p0), [#allocation12], 128   ;;  %p2056_p3 = pmov %p2055_p0 }
  0xbb   : > { %v1537_v0 = vmov 0.0   ;;  %v1538_v1 = vmov 0   ;;  %v346_v2 = vld [vmem:[%s1816_s9 + $0x8] sm:$0xff]  ;;  %v348_v4 = vld [vmem:[%s1816_s9 + $0x18] sm:$0xff]  ;;  %v345_v7 = vld [vmem:[%s1816_s9] sm:$0xff]  ;;  %vm381_vm0 = vcmask 588800  }
  0xbc   : > { %1505 = vsyncadd (%p2056_p3), [#allocation12], 4294967168  ;;  %458 = vmatprep.mubr.f32.mxu0 %v1537_v0  ;;  %547 = vmatprep.mubr.f32.mxu1 %v1537_v0  ;;  %v350_v3 = vld [vmem:[%s1816_s9 + $0x28] sm:$0xff]  ;;  %v352_v6 = vld [vmem:[%s1816_s9 + $0x38] sm:$0xff]  ;;  %s1054_s27 = sshll.u32 %s1812_s8, 5  ;;  %s1087_s29 = sshll.u32 %s1596_s25, 9 }
  0xbd   : > { %1242 = vset.pattern.permute.xlu0 %v1538_v1  ;;  %1243 = vset.pattern.permute.xlu1 %v1538_v1  ;;  %v1088_v5 = vpack.c.bf16 %v350_v3, %v346_v2  ;;  %v349_v8 = vld [vmem:[%s1816_s9 + $0x20] sm:$0xff]  ;;  %v1104_v9 = vpack.c.bf16 %v352_v6, %v348_v4  ;;  %v347_v11 = vld [vmem:[%s1816_s9 + $0x10] sm:$0xff]  ;;  %v354_v13 = vld [vmem:[%s1816_s9 + $0x48] sm:$0xff]  ;;  %s338_s15 = scalar_lea.vmem [#allocation13], %s1054_s27  ;;  %s1986_s16 = scalar_lea.hbm %s2035_s6, %s1087_s29 }
  0xbe   : > { %v1090_v10 = vpack.c.bf16 %v349_v8, %v345_v7  ;;  %v351_v12 = vld [vmem:[%s1816_s9 + $0x30] sm:$0xff]  ;;  %v358_v15 = vld [vmem:[%s1816_s9 + $0x68] sm:$0xff]  ;;  %v356_v16 = vld [vmem:[%s1816_s9 + $0x58] sm:$0xff]  ;;  %s920_s17 = sshll.u32 %s338_s15, 4  ;;  %s906_s25 = scalar_lea.sflag [#allocation4], %s1812_s8  ;;  %s1988_s17 = int_to_ptr.vmem [resolvable:$true] %s920_s17 }
  0xbf   : > { %1089 = vmatprep.subr.bf16.mxu0 %v1088_v5  ;;  %v1106_v14 = vpack.c.bf16 %v351_v12, %v347_v11  ;;  %v360_v17 = vld [vmem:[%s1816_s9 + $0x78] sm:$0xff]  ;;  %1105 = vmatprep.subr.bf16.mxu1 %v1104_v9  ;;  %v1092_v18 = vpack.c.bf16 %v358_v15, %v354_v13  ;;  %v353_v20 = vld [vmem:[%s1816_s9 + $0x40] sm:$0xff]  ;;  %v355_v22 = vld [vmem:[%s1816_s9 + $0x50] sm:$0xff]  ;;  %s1446_s13 = scalar_lea.vmem %s1988_s17, 512  ;;  %s1539_s19 = smov [#allocation13]  }
  0xc0   : > { %1091 = vmatpush1.bf16.msra.mxu0 %v1090_v10  ;;  %v1108_v19 = vpack.c.bf16 %v360_v17, %v356_v16  ;;  %v357_v21 = vld [vmem:[%s1816_s9 + $0x60] sm:$0xff]  ;;  %v359_v24 = vld [vmem:[%s1816_s9 + $0x70] sm:$0xff]  ;;  %v362_v25 = vld [vmem:[%s1816_s9 + $0x88] sm:$0xff]  ;;  %p1447_p7 = scmp.ne.s32.totalorder %s1988_s17, %s1446_s13  ;;  %s1450_s14 = sshll.u32 %s1539_s19, 4  ;;  %s1451_s14 = int_to_ptr.vmem [resolvable:$false] %s1450_s14 }
  0xc1   : > { %1107 = vmatpush1.bf16.msra.mxu1 %v1106_v14  ;;  %v1094_v23 = vpack.c.bf16 %v357_v21, %v353_v20  ;;  %v366_v26 = vld [vmem:[%s1816_s9 + $0xa8] sm:$0xff]  ;;  %1093 = vmatprep.subr.bf16.mxu0 %v1092_v18  ;;  %v1110_v27 = vpack.c.bf16 %v359_v24, %v355_v22  ;;  %v364_v29 = vld [vmem:[%s1816_s9 + $0x98] sm:$0xff]  ;;  %v361_v31 = vld [vmem:[%s1816_s9 + $0x80] sm:$0xff]  ;;  %s1452_s7 = scalar_lea.vmem %s1451_s14, 1024  ;;  %p1453_p2 = scmp.lt.s32.totalorder %s1988_s17, %s1451_s14 }
  0xc2   : > { %1109 = vmatprep.subr.bf16.mxu1 %v1108_v19  ;;  %v1096_v28 = vpack.c.bf16 %v366_v26, %v362_v25  ;;  %v368_v30 = vld [vmem:[%s1816_s9 + $0xb8] sm:$0xff]  ;;  %v365_v33 = vld [vmem:[%s1816_s9 + $0xa0] sm:$0xff]  ;;  %v363_v34 = vld [vmem:[%s1816_s9 + $0x90] sm:$0xff]  ;;  %p1448_p11 = pnand %p1447_p7, %p1764_p5  ;;  %p1454_p12 = scmp.lt.s32.totalorder %s1452_s7, %s1446_s13 }
  0xc3   : > { %v1112_v32 = vpack.c.bf16 %v368_v30, %v364_v29  ;;  %v367_v35 = vld [vmem:[%s1816_s9 + $0xb0] sm:$0xff]  ;;  %v1098_v36 = vpack.c.bf16 %v365_v33, %v361_v31  ;;  %v370_v37 = vld [vmem:[%s1816_s9 + $0xc8] sm:$0xff]  ;;  %v372_v39 = vld [vmem:[%s1816_s9 + $0xd8] sm:$0xff] }
  0xc4   : > { %1095 = vmatpush1.bf16.msra.mxu0 %v1094_v23  ;;  %v374_v38 = vld [vmem:[%s1816_s9 + $0xe8] sm:$0xff]  ;;  %v1114_v40 = vpack.c.bf16 %v367_v35, %v363_v34  ;;  %v376_v42 = vld [vmem:[%s1816_s9 + $0xf8] sm:$0xff]  ;;  %v369_v43 = vld [vmem:[%s1816_s9 + $0xc0] sm:$0xff]  ;;  %p1449_p1 = pneg %p1448_p11  ;;  %p1455_p9 = por %p1454_p12, %p1453_p2 }
  0xc5   : > { %1111 = vmatpush1.bf16.msra.mxu1 %v1110_v27  ;;  %1097 = vmatprep.subr.bf16.mxu0 %v1096_v28  ;;  %v1100_v41 = vpack.c.bf16 %v374_v38, %v370_v37  ;;  %v373_v44 = vld [vmem:[%s1816_s9 + $0xe0] sm:$0xff]  ;;  %v1116_v45 = vpack.c.bf16 %v376_v42, %v372_v39  ;;  %v371_v46 = vld [vmem:[%s1816_s9 + $0xd0] sm:$0xff]  ;;  %v378_v51 = vld [vmem:[%s1816_s9 + $0x108] sm:$0xff] }
  0xc6   : > { %1113 = vmatprep.subr.bf16.mxu1 %v1112_v32  ;;  %v375_v47 = vld [vmem:[%s1816_s9 + $0xf0] sm:$0xff]  ;;  %v1102_v48 = vpack.c.bf16 %v373_v44, %v369_v43  ;;  %v572_v50 = vld [vmem:[#allocation7] sm:$0xff]  ;;  %v380_v53 = vld [vmem:[%s1816_s9 + $0x118] sm:$0xff]  ;;  %p1456_p13 = pnand %p1455_p9, %p1449_p1 }
  0xc7   : > { %v1118_v49 = vpack.c.bf16 %v375_v47, %v371_v46  ;;  %578 = vperm.xlu0 %1242, %v572_v50   ;;  %v612_v52 = vld [vmem:[#allocation8] sm:$0xff]  ;;  %v573_v54 = vld [vmem:[#allocation7 + $0x8] sm:$0xff]  ;;  %v379_v57 = vld [vmem:[%s1816_s9 + $0x110] sm:$0xff] }
  0xc8   : > { %1099 = vmatpush1.bf16.msra.mxu0 %v1098_v36  ;;  %618 = vperm.xlu1 %1243, %v612_v52   ;;  %v613_v55 = vld [vmem:[#allocation8 + $0x8] sm:$0xff]  ;;  %v377_v56 = vld [vmem:[%s1816_s9 + $0x100] sm:$0xff]  ;;  %v574_v59 = vld [vmem:[#allocation7 + $0x10] sm:$0xff] }
  0xc9   : > { %1115 = vmatpush1.bf16.msra.mxu1 %v1114_v40  ;;  %1101 = vmatprep.subr.bf16.mxu0 %v1100_v41  ;;  %v341_v58 = vld [vmem:[#allocation5] sm:$0xff]  ;;  %v575_v60 = vld [vmem:[#allocation7 + $0x18] sm:$0xff]  ;;  %v342_v61 = vld [vmem:[#allocation5 + $0x8] sm:$0xff] }
  0xca   : > { %1117 = vmatprep.subr.bf16.mxu1 %v1116_v45  ;;  %v614_v62 = vld [vmem:[#allocation8 + $0x10] sm:$0xff]  ;;  %v615_v63 = vld [vmem:[#allocation8 + $0x18] sm:$0xff]  ;;  %v749_v2 = vld [vmem:[#allocation11] sm:$0xff] }
  0xcb   : > { %583 = vperm.xlu0 %1242, %v573_v54   ;;  %v343_v1 = vld [vmem:[#allocation5 + $0x10] sm:$0xff]  ;;  %v344_v3 = vld [vmem:[#allocation5 + $0x18] sm:$0xff] }
  0xcc   : > { %1103 = vmatpush1.bf16.msra.mxu0 %v1102_v48  ;;  %623 = vperm.xlu1 %1243, %v613_v55  }
  0xcd   : > { %1119 = vmatpush1.bf16.msra.mxu1 %v1118_v49  ;;  %410 = vmatprep.subr.mxu0 %v378_v51 }
  0xce   : > { %499 = vmatprep.subr.mxu1 %v380_v53 }
  0xcf   : > { %588 = vperm.xlu0 %1242, %v574_v59  }
  0xd0   : > { %411 = vmatpush1.msra.mxu0 %v377_v56  ;;  %593 = vperm.xlu1 %1243, %v575_v60  }
  0xd1   : > { %500 = vmatpush1.msra.mxu1 %v379_v57  ;;  %1055 = vmatmul.mubr.msk.f32.vlgmr.msra.gmra.mrb[0].mxu0 %vm381_vm0, %v341_v58 }
  0xd2   : > { %1059 = vmatmul.mubr.msk.f32.vlgmr.msra.gmra.mrb[0].mxu1 %vm381_vm0, %v341_v58  ;;  %464 = vmatprep.mubr.f32.mxu0 %v1537_v0 }
  0xd3   : > { %553 = vmatprep.mubr.f32.mxu1 %v1537_v0  ;;  %628 = vperm.xlu0 %1242, %v614_v62  }
  0xd4   : > { %633 = vperm.xlu1 %1243, %v615_v63  }
  0xd5   : > { %1056 = vmatmul.mubr.msk.f32.gmra.mrb[2].mxu0 %vm381_vm0, %v342_v61 }
  0xd6   : > { %1060 = vmatmul.mubr.msk.f32.gmra.mrb[2].mxu1 %vm381_vm0, %v342_v61  ;;  %470 = vmatprep.mubr.f32.mxu0 %v1537_v0 }
  0xd7   : > { %559 = vmatprep.mubr.f32.mxu1 %v1537_v0  ;;  %752 = vperm.xlu0 %1242, %v749_v2  }
  0xd9   : > { %1057 = vmatmul.mubr.msk.f32.gmra.mrb[4].mxu0 %vm381_vm0, %v343_v1 }
  0xda   : > { %1061 = vmatmul.mubr.msk.f32.gmra.mrb[4].mxu1 %vm381_vm0, %v343_v1  ;;  %476 = vmatprep.mubr.f32.mxu0 %v1537_v0 }
  0xdb   : > { %565 = vmatprep.mubr.f32.mxu1 %v1537_v0 }
  0xdd   : > { %1058 = vmatmul.mubr.msk.f32.gmra.mrb[6].mxu0 %vm381_vm0, %v344_v3 }
  0xde   : > { %1062 = vmatmul.mubr.msk.f32.gmra.mrb[6].mxu1 %vm381_vm0, %v344_v3  ;;  %823 = vmatprep.mubr.f32.mxu0 %v1537_v0 }
  0xdf   : > { %894 = vmatprep.mubr.f32.mxu1 %v1537_v0 }
 0x146   : > { %v579_v4 = vpop.permute.xlu0 %578 }
 0x147   : > { %v619_v5 = vpop.permute.xlu1 %618 }
 0x14a   : > { %v584_v6 = vpop.permute.xlu0 %583 }
 0x14b   : > { %v624_v16 = vpop.permute.xlu1 %623 }
 0x14e   : > { %v589_v24 = vpop.permute.xlu0 %588 }
 0x14f   : > { %v1907_v43 = vpop.permute.xlu1 %593 }
 0x152   : > { %v629_v48 = vpop.permute.xlu0 %628 }
 0x1a4   : > { %v460_v7 = vpop.f32.mrb[0].mxu0 }
 0x1a5   : > { %v596_v8 = vmul.f32 %v579_v4, %v460_v7  ;;  %v549_v9 = vpop.f32.mrb[0].mxu1  ;;  %v462_v10 = vpop.f32.mrb[1].mxu0 }
 0x1a6   : > { %v598_v11 = vmul.f32 %v579_v4, %v549_v9  ;;  %v597_v12 = vmul.f32 %v579_v4, %v462_v10  ;;  %v551_v13 = vpop.f32.mrb[1].mxu1  ;;  %v634_v9 = vpop.permute.xlu1 %633 }
 0x1a7   : > { %v1888_v14 = vadd.f32 %v619_v5, %v596_v8  ;;  %v599_v15 = vmul.f32 %v579_v4, %v551_v13 }
 0x1a8   : > { %v1890_v17 = vadd.f32 %v619_v5, %v598_v11  ;;  %v1892_v18 = vadd.f32 %v619_v5, %v597_v12  ;;  %v466_v19 = vpop.f32.mrb[2].mxu0 }
 0x1a9   : > { %v668_v0 = vmin.f32 %v1888_v14, 0.0  ;;  %v1895_v20 = vadd.f32 %v619_v5, %v599_v15  ;;  %v600_v21 = vmul.f32 %v584_v6, %v466_v19  ;;  %v555_v22 = vpop.f32.mrb[2].mxu1  ;;  %v468_v23 = vpop.f32.mrb[3].mxu0  ;;  %vm652_vm1 = vcmp.gt.f32.partialorder %v1888_v14, 0.0 }
 0x1aa   : > { %v670_v25 = vmin.f32 %v1890_v17, 0.0  ;;  %v669_v26 = vmin.f32 %v1892_v18, 0.0  ;;  %v557_v27 = vpop.f32.mrb[3].mxu1  ;;  %v602_v33 = vmul.f32 %v584_v6, %v555_v22  ;;  %v601_v34 = vmul.f32 %v584_v6, %v468_v23 }
 0x1ab   : > { %v684_v28 = vmul.f32 1.442695, %v668_v0  ;;  %v671_v29 = vmin.f32 %v1895_v20, 0.0  ;;  %v1900_v30 = vadd.f32 %v624_v16, %v600_v21  ;;  %v603_v41 = vmul.f32 %v584_v6, %v557_v27 }
 0x1ac   : > { %v688_v31 = vmul.f32 1.442695, %v670_v25  ;;  %v686_v32 = vmul.f32 1.442695, %v669_v26  ;;  %v472_v35 = vpop.f32.mrb[4].mxu0  ;;  %v1903_v39 = vadd.f32 %v624_v16, %v602_v33  ;;  %v1905_v40 = vadd.f32 %v624_v16, %v601_v34 }
 0x1ad   : > { %1244 = vpow2.f32 %v684_v28  ;;  %v672_v36 = vmin.f32 %v1900_v30, 0.0  ;;  %v561_v37 = vpop.f32.mrb[4].mxu1  ;;  %v474_v38 = vpop.f32.mrb[5].mxu0  ;;  %v690_v44 = vmul.f32 1.442695, %v671_v29  ;;  %v604_v46 = vmul.f32 %v589_v24, %v472_v35 }
 0x1ae   : > { %1246 = vpow2.f32 %v688_v31  ;;  %v563_v42 = vpop.f32.mrb[5].mxu1  ;;  %v606_v47 = vmul.f32 %v589_v24, %v561_v37  ;;  %v674_v49 = vmin.f32 %v1903_v39, 0.0  ;;  %v673_v51 = vmin.f32 %v1905_v40, 0.0 }
 0x1af   : > { %v692_v45 = vmul.f32 1.442695, %v672_v36  ;;  %1248 = vpow2.f32 %v686_v32  ;;  %v1911_v52 = vadd.f32 %v624_v16, %v603_v41  ;;  %v1913_v53 = vadd.f32 %v629_v48, %v604_v46 }
 0x1b0   : > { %v478_v50 = vpop.f32.mrb[6].mxu0  ;;  %v696_v56 = vmul.f32 1.442695, %v674_v49  ;;  %v1915_v57 = vadd.f32 %v629_v48, %v606_v47  ;;  %v605_v58 = vmul.f32 %v589_v24, %v474_v38  ;;  %v607_v59 = vmul.f32 %v589_v24, %v563_v42 }
 0x1b1   : > { %1250 = vpow2.f32 %v692_v45  ;;  %v567_v54 = vpop.f32.mrb[6].mxu1  ;;  %v480_v55 = vpop.f32.mrb[7].mxu0  ;;  %v694_v61 = vmul.f32 1.442695, %v673_v51  ;;  %v675_v62 = vmin.f32 %v1911_v52, 0.0  ;;  %v676_v63 = vmin.f32 %v1913_v53, 0.0 }
 0x1b2   : > { %v569_v60 = vpop.f32.mrb[7].mxu1  ;;  %1252 = vpow2.f32 %v690_v44  ;;  %v678_v1 = vmin.f32 %v1915_v57, 0.0  ;;  %v1920_v3 = vadd.f32 %v629_v48, %v605_v58  ;;  %v1922_v4 = vadd.f32 %v629_v48, %v607_v59 }
 0x1b3   : > { %1254 = vpow2.f32 %v696_v56  ;;  %v698_v2 = vmul.f32 1.442695, %v675_v62  ;;  %v700_v5 = vmul.f32 1.442695, %v676_v63  ;;  %v608_v6 = vmul.f32 %v1907_v43, %v478_v50 }
 0x1b4   : > { %1256 = vpow2.f32 %v694_v61  ;;  %v610_v7 = vmul.f32 %v1907_v43, %v567_v54  ;;  %v704_v10 = vmul.f32 1.442695, %v678_v1  ;;  %v677_v11 = vmin.f32 %v1920_v3, 0.0 }
 0x1b5   : > { %1258 = vpow2.f32 %v698_v2  ;;  %vm654_vm2 = vcmp.gt.f32.partialorder %v1890_v17, 0.0  ;;  %v679_v13 = vmin.f32 %v1922_v4, 0.0  ;;  %v1930_v15 = vadd.f32 %v634_v9, %v608_v6 }
 0x1b6   : > { %vm653_vm3 = vcmp.gt.f32.partialorder %v1892_v18, 0.0  ;;  %vm656_vm4 = vcmp.gt.f32.partialorder %v1900_v30, 0.0  ;;  %v702_v16 = vmul.f32 1.442695, %v677_v11  ;;  %v1934_v19 = vadd.f32 %v634_v9, %v610_v7 }
 0x1b7   : > { %v1245_v8 = vpop.eup %1244  ;;  %vm658_vm5 = vcmp.gt.f32.partialorder %v1903_v39, 0.0  ;;  %1260 = vpow2.f32 %v700_v5  ;;  %v680_v22 = vmin.f32 %v1930_v15, 0.0  ;;  %vm657_vm6 = vcmp.gt.f32.partialorder %v1905_v40, 0.0 }
 0x1b8   : > { %v1247_v12 = vpop.eup %1246  ;;  %v1063_v21 = vadd.f32 -1.0, %v1245_v8  ;;  %1262 = vpow2.f32 %v704_v10  ;;  %v682_v25 = vmin.f32 %v1934_v19, 0.0  ;;  %v706_v27 = vmul.f32 1.442695, %v679_v13 }
 0x1b9   : > { %v1249_v0 = vpop.eup %1248  ;;  %v1065_v24 = vadd.f32 -1.0, %v1247_v12  ;;  %v708_v28 = vmul.f32 1.442695, %v680_v22  ;;  %v609_v29 = vmul.f32 %v1907_v43, %v480_v55  ;;  %1264 = vpow2.f32 %v702_v16 }
 0x1ba   : > { %v712_v32 = vmul.f32 1.442695, %v682_v25  ;;  %v611_v33 = vmul.f32 %v1907_v43, %v569_v60  ;;  %v1064_v34 = vadd.f32 -1.0, %v1249_v0  ;;  %v732_v36 = vsel %vm652_vm1, %v1888_v14, %v1063_v21  ;;  %v748_v25 = vld [vmem:[#allocation10] sm:$0xff] }
 0x1bb   : > { %v1251_v23 = vpop.eup %1250  ;;  %1266 = vpow2.f32 %v708_v28  ;;  %v1948_v38 = vadd.f32 %v634_v9, %v609_v29  ;;  %v734_v42 = vsel %vm654_vm2, %v1890_v17, %v1065_v24  ;;  %vm655_vm7 = vcmp.gt.f32.partialorder %v1895_v20, 0.0 }
 0x1bc   : > { %v1067_v26 = vadd.f32 -1.0, %v1251_v23  ;;  %v1253_v31 = vpop.eup %1252  ;;  %1268 = vpow2.f32 %v712_v32  ;;  %v651_v43 = vadd.f32 %v634_v9, %v611_v33  ;;  %v733_v49 = vsel %vm653_vm3, %v1892_v18, %v1064_v34 }
 0x1bd   : > { %v1255_v35 = vpop.eup %1254  ;;  %1270 = vpow2.f32 %v706_v27  ;;  %v681_v45 = vmin.f32 %v1948_v38, 0.0  ;;  %v1066_v14 = vadd.f32 -1.0, %v1253_v31  ;;  %vm659_vm8 = vcmp.gt.f32.partialorder %v1911_v52, 0.0 }
 0x1be   : > { %v736_v37 = vsel %vm656_vm4, %v1900_v30, %v1067_v26  ;;  %v1257_v41 = vpop.eup %1256  ;;  %v1069_v44 = vadd.f32 -1.0, %v1255_v35  ;;  %v683_v48 = vmin.f32 %v651_v43, 0.0  ;;  %vm660_vm9 = vcmp.gt.f32.partialorder %v1913_v53, 0.0  ;;  %v753_v26 = vpop.permute.xlu0 %752 }
 0x1bf   : > { %v1068_v46 = vadd.f32 -1.0, %v1257_v41  ;;  %v1259_v47 = vpop.eup %1258  ;;  %v1122_v50 = vpack.c.bf16 %v736_v37, %v732_v36  ;;  %v710_v17 = vmul.f32 1.442695, %v681_v45  ;;  %v735_v59 = vsel %vm655_vm7, %v1895_v20, %v1066_v14 }
 0x1c0   : > { %v738_v30 = vsel %vm658_vm5, %v1903_v39, %v1069_v44  ;;  %v1070_v54 = vadd.f32 -1.0, %v1259_v47  ;;  %v714_v56 = vmul.f32 1.442695, %v683_v48  ;;  %vm664_vm10 = vcmp.gt.f32.partialorder %v1930_v15, 0.0 }
 0x1c1   : > { %v737_v51 = vsel %vm657_vm6, %v1905_v40, %v1068_v46  ;;  %v1130_v55 = vpack.c.bf16 %v738_v30, %v734_v42  ;;  %v1261_v39 = vpop.eup %1260  ;;  %1272 = vpow2.f32 %v710_v17  ;;  %vm662_vm11 = vcmp.gt.f32.partialorder %v1915_v57, 0.0 }
 0x1c2   : > { %v1120_v58 = vpack.c.bf16 %v737_v51, %v733_v49  ;;  %v739_v18 = vsel %vm659_vm8, %v1911_v52, %v1070_v54  ;;  %v1263_v60 = vpop.eup %1262  ;;  %1274 = vpow2.f32 %v714_v56  ;;  %v1071_v62 = vadd.f32 -1.0, %v1261_v39 }
 0x1c3   : > { %v1128_v61 = vpack.c.bf16 %v739_v18, %v735_v59  ;;  %v1265_v40 = vpop.eup %1264  ;;  %v1073_v1 = vadd.f32 -1.0, %v1263_v60  ;;  %vm666_vm12 = vcmp.gt.f32.partialorder %v1934_v19, 0.0  ;;  %vm661_vm13 = vcmp.gt.f32.partialorder %v1920_v3, 0.0 }
 0x1c4   : > { %1121 = vmatprep.subr.bf16.mxu0 %v1120_v58  ;;  %v740_v52 = vsel %vm660_vm9, %v1913_v53, %v1071_v62  ;;  %v1072_v11 = vadd.f32 -1.0, %v1265_v40  ;;  %vm665_vm14 = vcmp.gt.f32.partialorder %v1948_v38, 0.0  ;;  %vm663_vm15 = vcmp.gt.f32.partialorder %v1922_v4, 0.0 }
 0x1c5   : > { %1123 = vmatpush1.bf16.msra.mxu0 %v1122_v50  ;;  %1129 = vmatprep.subr.bf16.mxu1 %v1128_v61  ;;  %v1267_v63 = vpop.eup %1266  ;;  %v742_v8 = vsel %vm662_vm11, %v1915_v57, %v1073_v1  ;;  %vm667_vm0 = vcmp.gt.f32.partialorder %v651_v43, 0.0  ;;  %vm755_vm1 = vcmask 261120  }
 0x1c6   : > { %1131 = vmatpush1.bf16.msra.mxu1 %v1130_v55  ;;  %v1269_v2 = vpop.eup %1268  ;;  %v1075_v5 = vadd.f32 -1.0, %v1267_v63  ;;  %v741_v57 = vsel %vm661_vm13, %v1920_v3, %v1072_v11 }
 0x1c7   : > { %v1271_v6 = vpop.eup %1270  ;;  %v1077_v20 = vadd.f32 -1.0, %v1269_v2 }
 0x1c8   : > { %v744_v7 = vsel %vm664_vm10, %v1930_v15, %v1075_v5  ;;  %v1074_v16 = vadd.f32 -1.0, %v1271_v6 }
 0x1c9   : > { %v746_v9 = vsel %vm666_vm12, %v1934_v19, %v1077_v20  ;;  %v1126_v10 = vpack.c.bf16 %v744_v7, %v740_v52 }
 0x1ca   : > { %v1134_v12 = vpack.c.bf16 %v746_v9, %v742_v8  ;;  %v743_v22 = vsel %vm663_vm15, %v1922_v4, %v1074_v16 }
 0x1cb   : > { %v1273_v13 = vpop.eup %1272 }
 0x1cc   : > { %v1275_v0 = vpop.eup %1274  ;;  %v1076_v21 = vadd.f32 -1.0, %v1273_v13 }
 0x1cd   : > { %v1078_v53 = vadd.f32 -1.0, %v1275_v0 }
 0x1ce   : > { %v745_v15 = vsel %vm665_vm14, %v1948_v38, %v1076_v21 }
 0x1cf   : > { %v1124_v19 = vpack.c.bf16 %v745_v15, %v741_v57  ;;  %v747_v23 = vsel %vm667_vm0, %v651_v43, %v1078_v53 }
 0x1d0   : > { %v1132_v24 = vpack.c.bf16 %v747_v23, %v743_v22 }
 0x1d1   : > { %1125 = vmatprep.subr.bf16.mxu0 %v1124_v19 }
 0x1d2   : > { %1133 = vmatprep.subr.bf16.mxu1 %v1132_v24  ;;  %1127 = vmatpush1.bf16.msra.mxu0 %v1126_v10 }
 0x1d3   : > { %1135 = vmatpush1.bf16.msra.mxu1 %v1134_v12 }
 0x1d5   : > { %1079 = vmatmul.mubr.msk.f32.vlgmr.msra.gmra.mrb[8].mxu0 %vm755_vm1, %v748_v25 }
 0x1d6   : > { %1080 = vmatmul.mubr.msk.f32.vlgmr.msra.gmra.mrb[8].mxu1 %vm755_vm1, %v748_v25 }
 0x2a8   : > { %v825_v27 = vpop.f32.mrb[8].mxu0 }
 0x2a9   : > { %v826_v3 = vadd.f32 %v825_v27, %v753_v26  ;;  %v896_v4 = vpop.f32.mrb[8].mxu1  ;;  %v827_v28 = vpop.f32.mrb[9].mxu0 }
 0x2aa   : > { %v897_v29 = vadd.f32 %v896_v4, %v753_v26  ;;  %v828_v31 = vadd.f32 %v827_v28, %v753_v26  ;;  %v898_v32 = vpop.f32.mrb[9].mxu1 }
 0x2ab   : > { %901 = vst [vmem:[%s338_s15] sm:$0xff] %v826_v3  ;;  %v899_v33 = vadd.f32 %v898_v32, %v753_v26 }
 0x2ac   : > { %903 = vst [vmem:[%s338_s15 + $0x10] sm:$0xff] %v897_v29  ;;  %902 = vst [vmem:[%s338_s15 + $0x8] sm:$0xff] %v828_v31 }
 0x2ad   : > { %904 = vst [vmem:[%s338_s15 + $0x18] sm:$0xff] %v899_v33 }
 0x2ae   : > { %1459 = shalt.err (!%p1456_p13)
}
 0x2af   : > { %s1460_s10 = scalar_lea.hbm %s1986_s16, 512  ;;  %s1464_s11 = scalar_lea.hbm %s2035_s6, 2048 }
 0x2b0   : > { %p1461_p10 = scmp.ne.s32.totalorder %s1986_s16, %s1460_s10  ;;  %p1465_p6 = scmp.lt.u32.totalorder %s1986_s16, %s2035_s6 }
 0x2b1   : > { %p1466_p0 = scmp.lt.u32.totalorder %s1464_s11, %s1460_s10  ;;  %p1468_p7 = scmp.lt.u32.totalorder %s1460_s10, %s1986_s16 }
 0x2b2   : > { %p1462_p4 = pnand %p1461_p10, %p1764_p5 }
 0x2b3   : > { %p1467_p3 = por %p1466_p0, %p1465_p6 }
 0x2b4   : > { %p1463_p8 = pneg %p1462_p4 }
 0x2b5   : > { %p1469_p11 = por %p1468_p7, %p1467_p3 }
 0x2b7   : > { %p1470_p1 = pnand %p1469_p11, %p1463_p8 }
 0x2b9   : > { %1473 = shalt.err (!%p1470_p1)
}
 0x2ba   : > { %1160 = dma.vmem_to_hbm [thread:$0]  (%p1764_p5), %s1988_s17, 512, %s1986_s16, %s906_s25  }
 0x2bb PF: > { %p1197_p2 = scmp.ge.s32.totalorder %s1524_s24, 2  ;;  %s932_s29 = sand.u32 1, %s1512_s21  }
 0x2bc   : > { %p2057_p12 = scmp.ne.s32.totalorder %s2041_s28, 0  ;;  %s933_s15 = scalar_lea.sflag [#allocation4], %s932_s29 }
 0x2be   : > { %p1183_p9 = pnand %p1197_p2, %p2057_p12 }
 0x2c0   : > { %1507 = dma.done.wait (!%p1183_p9), %s933_s15, 512  }
 0x2c1   : > { %1509 = vsyncadd (!%p1183_p9), %s933_s15, 4294966784  ;;  %p22_p13 = scmp.ge.s32.totalorder %s1750_s18, 6   ;;  %s2058_s21 = smov %s1516_s22 }
 0x2c2   : > { %s2059_s22 = smov %s1520_s23  ;;  %s2060_s23 = smov %s1760_s12 }
 0x2c3   : > { %s2061_s24 = smov %s1750_s18  ;;  %24 = sbr.rel (!%p22_p13) target bundleno = 10 (0xa), region = 109 }
 0x2ca   :  { %938 = vsyncpa [#allocation3], 1 }
 0x2cb   :  { %940 = vsyncpa [#allocation3 + $0x1], 1 }
 0x2cc   :  { %941 = vsyncpa [#allocation6], 1 }
 0x2cd   :  { %942 = vsyncpa [#allocation9], 1 }
 0x2ce   :  { %943 = vsyncpa [#allocation12], 1 }
 0x2cf   :  { %944 = vsyncpa [#allocation4], 1 }
 0x2d0   :  { %946 = vsyncpa [#allocation4 + $0x1], 1 }

</bundles_post_ra>
